<compile_context>
chip_gen: v7x
topology: tpu7x:2x2x1
jax: 0.10.0
libtpu: 0.0.40
codegen_flags: <defaults>
</compile_context>

<pallas_src>
import functools
import math

import jax
import jax.numpy as jnp
from jax.experimental import pallas as pl
from jax.experimental.pallas import tpu as pltpu

HIDDEN = 64
NUM_HEADS = 8
HEAD_DIM = HIDDEN // NUM_HEADS
FFN_DIM = HIDDEN * 4
LN_EPS = 1e-5
LEAKY_SLOPE = 0.01  # PyTorch nn.LeakyReLU default


def _layernorm(y, gamma, beta):
    mu = jnp.mean(y, axis=-1, keepdims=True)
    var = jnp.mean((y - mu) ** 2, axis=-1, keepdims=True)
    return (y - mu) * jax.lax.rsqrt(var + LN_EPS) * gamma + beta


def _mha_block_kernel(x_ref, wq_ref, bq_ref, wk_ref, bk_ref, wv_ref, bv_ref,
                      wo_ref, bo_ref, g1_ref, be1_ref,
                      w1_ref, b1_ref, w2_ref, b2_ref, g2_ref, be2_ref,
                      o_ref, *, bt, seq):
    R = bt * seq

    x = x_ref[...]                                  # (R, 64) input dtype
    x_f32 = x.astype(jnp.float32)                   # f32 copy for residual / LayerNorm
    x_bf = x.astype(jnp.bfloat16)                   # bf16 operand for the MXU

    def proj(w_ref, b_ref):                         # (R, 64) f32
        return (jnp.dot(x_bf, w_ref[...], preferred_element_type=jnp.float32)
                + b_ref[...])

    def to_bds(t):
        # (R, 64) f32 -> (Bt*NH, HEAD_DIM, S) bf16 using only last-two-dim transposes
        # and sublane-group / leading-dim reshapes.
        t = t.astype(jnp.bfloat16).reshape(bt, seq, HIDDEN)
        t = jnp.swapaxes(t, -1, -2)                              # (Bt, 64, S)
        return t.reshape(bt * NUM_HEADS, HEAD_DIM, seq)          # (BH, D, S)

    # 1/sqrt(head_dim) is folded into wq/bq host-side.
    q_t = to_bds(proj(wq_ref, bq_ref))                           # (BH, D, S)
    k_t = to_bds(proj(wk_ref, bk_ref))                           # (BH, D, S)
    v_t = to_bds(proj(wv_ref, bv_ref))                           # (BH, D, S)

    q = jnp.swapaxes(q_t, -1, -2)                                # (BH, S, D)
    k = jnp.swapaxes(k_t, -1, -2)                                # (BH, S, D)

    # Softmax (max/exp/sum/normalize) in f32.
    s = jnp.einsum('bqd,bkd->bqk', q, k,
                   preferred_element_type=jnp.float32)           # (BH, S, S) f32
    s = s - jnp.max(s, axis=-1, keepdims=True)
    p = jnp.exp(s)
    l = jnp.sum(p, axis=-1, keepdims=True)
    p = (p * (1.0 / l)).astype(jnp.bfloat16)                     # exact normalization

    # Attention output computed TRANSPOSED: out_T[b,d,q] = sum_k v_T[b,d,k] * p[b,q,k],
    # so heads merge back to (R, 64) with a single minor-dim transpose.
    o_t = jnp.einsum('bdk,bqk->bdq', v_t, p,
                     preferred_element_type=jnp.float32)         # (BH, D, S) f32
    attn = jnp.swapaxes(o_t.reshape(bt, HIDDEN, seq), -1, -2)    # (Bt, S, 64)
    attn = attn.reshape(R, HIDDEN)

    # Output projection (attention / output dropout are identity in eval mode).
    attn = (jnp.dot(attn.astype(jnp.bfloat16), wo_ref[...],
                    preferred_element_type=jnp.float32) + bo_ref[...])

    # Residual + LayerNorm 1 (f32)
    y = _layernorm(x_f32 + attn, g1_ref[...], be1_ref[...])      # (R, 64)

    # FFN: Linear(64 -> 256) -> LeakyReLU -> Linear(256 -> 64)
    h1 = (jnp.dot(y.astype(jnp.bfloat16), w1_ref[...],
                  preferred_element_type=jnp.float32) + b1_ref[...])
    h1 = jnp.where(h1 > 0, h1, LEAKY_SLOPE * h1)
    h2 = (jnp.dot(h1.astype(jnp.bfloat16), w2_ref[...],
                  preferred_element_type=jnp.float32) + b2_ref[...])

    # Residual + LayerNorm 2 (f32)
    out = _layernorm(y + h2, g2_ref[...], be2_ref[...])
    o_ref[...] = out.astype(o_ref.dtype)


def _vmem_limit_bytes():
    """Explicit scoped-VMEM limit (v5e defaults to 16 MiB; v7x has 64 MiB physical)."""
    try:
        phys = int(pltpu.get_tpu_info().vmem_capacity_bytes)
    except Exception:
        phys = 64 * 1024 * 1024          # conservative: v7x per-core VMEM
    return min(int(phys * 3 // 4), 100 * 1024 * 1024)


def _choose_bt(B, S, vmem_limit_bytes):
    """VMEM-budget-driven batch tile: target a 1K-4K row slab per grid step."""
    # Conservative live-bytes per row (f32 activations + bf16 matmul copies + double-
    # buffered I/O tiles) plus the per-row share of the (heads, S, S) score/softmax bufs.
    bytes_per_row = 6400 + 96 * S
    budget = int(vmem_limit_bytes * 0.7)
    rows = max(S, min(4096, budget // bytes_per_row))
    bt = max(1, rows // S)
    if B >= 2:
        bt = min(bt, pl.cdiv(B, 2))      # keep >= 2 grid steps so v7x's 2nd TC has work
    bt = min(bt, B)
    # (8,128) layout rule: with >1 grid step the (bt*S, 64) block needs bt*S % 8 == 0.
    m = 8 // math.gcd(S, 8)
    bt = max(m, (bt // m) * m)
    steps = pl.cdiv(B, bt)
    if steps <= 1:
        return B                         # single full-array block; no divisibility needed
    if steps % 2 == 1:                   # best-effort even grid length (v7x megacore)
        cand = max(m, (pl.cdiv(B, steps + 1) // m) * m)
        if pl.cdiv(B, cand) % 2 == 0:
            bt = cand
    return bt


def multihead_attention_block(x, params):
    """x: (B, S, H) float32 (or bfloat16).  Returns (B, S, H) in x.dtype."""
    B, S, H = x.shape
    assert H == HIDDEN

    vmem_limit = _vmem_limit_bytes()
    bt = _choose_bt(B, S, vmem_limit)
    steps = pl.cdiv(B, bt)
    b_pad = steps * bt
    if b_pad != B:
        x = jnp.pad(x, ((0, b_pad - B), (0, 0), (0, 0)))   # zero rows: softmax/LN safe

    rt = bt * S
    x2 = x.reshape(b_pad * S, H)                           # layout-identical 2-D row slab

    bf16, f32 = jnp.bfloat16, jnp.float32
    scale = 1.0 / math.sqrt(HEAD_DIM)
    w_in, b_in = params["w_in"], params["b_in"]            # (3H, H), (1, 3H) torch layout

    weights = [
        (w_in[:HIDDEN] * scale).T.astype(bf16),            # wq (H,H), softmax scale folded
        (b_in[:, :HIDDEN] * scale).astype(f32),             # bq
        w_in[HIDDEN:2 * HIDDEN].T.astype(bf16),              # wk
        b_in[:, HIDDEN:2 * HIDDEN].astype(f32),               # bk
        w_in[2 * HIDDEN:].T.astype(bf16),                      # wv
        b_in[:, 2 * HIDDEN:].astype(f32),                       # bv
        params["w_out"].T.astype(bf16), params["b_out"].astype(f32),
        params["g1"].astype(f32), params["be1"].astype(f32),
        params["w1"].T.astype(bf16), params["b1"].astype(f32),
        params["w2"].T.astype(bf16), params["b2"].astype(f32),
        params["g2"].astype(f32), params["be2"].astype(f32),
    ]

    def full_spec(a):
        nd = a.ndim
        return pl.BlockSpec(a.shape, lambda i, nd=nd: (0,) * nd)

    kernel = pl.pallas_call(
        functools.partial(_mha_block_kernel, bt=bt, seq=S),
        out_shape=jax.ShapeDtypeStruct((b_pad * S, H), x.dtype),
        grid_spec=pltpu.PrefetchScalarGridSpec(
            num_scalar_prefetch=0,
            grid=(steps,),
            in_specs=[pl.BlockSpec((rt, H), lambda i: (i, 0))]
                     + [full_spec(w) for w in weights],
            out_specs=pl.BlockSpec((rt, H), lambda i: (i, 0)),
        ),
        compiler_params=pltpu.CompilerParams(
            dimension_semantics=("parallel",),
            vmem_limit_bytes=int(vmem_limit)),
    )
    out2 = kernel(x2, *weights)
    return out2.reshape(b_pad, S, H)[:B]


def reference_block(x, params):
    """Pure-JAX f32 reference (same math as the PyTorch module in eval mode)."""
    def per_batch(xb):
        S = xb.shape[0]
        qkv = xb @ params["w_in"].T + params["b_in"]
        q, k, v = jnp.split(qkv, 3, axis=-1)
        q = q.reshape(S, NUM_HEADS, HEAD_DIM).transpose(1, 0, 2)
        k = k.reshape(S, NUM_HEADS, HEAD_DIM).transpose(1, 0, 2)
        v = v.reshape(S, NUM_HEADS, HEAD_DIM).transpose(1, 0, 2)
        s = jnp.einsum('hqd,hkd->hqk', q, k) / math.sqrt(HEAD_DIM)
        p = jax.nn.softmax(s, axis=-1)
        o = jnp.einsum('hqk,hkd->hqd', p, v).transpose(1, 0, 2).reshape(S, HIDDEN)
        attn = o @ params["w_out"].T + params["b_out"]
        y = _layernorm(xb + attn, params["g1"], params["be1"])
        h1 = y @ params["w1"].T + params["b1"]
        h1 = jnp.where(h1 > 0, h1, LEAKY_SLOPE * h1)
        h2 = h1 @ params["w2"].T + params["b2"]
        return _layernorm(y + h2, params["g2"], params["be2"])
    return jax.vmap(per_batch)(x)


def init_params(key):
    ks = jax.random.split(key, 6)
    scale = 0.05
    f32 = jnp.float32
    return {
        # nn.MultiheadAttention in_proj / out_proj
        "w_in":  scale * jax.random.normal(ks[0], (3 * HIDDEN, HIDDEN), f32),
        "b_in":  scale * jax.random.normal(ks[1], (1, 3 * HIDDEN), f32),
        "w_out": scale * jax.random.normal(ks[2], (HIDDEN, HIDDEN), f32),
        "b_out": jnp.zeros((1, HIDDEN), f32),
        # LayerNorm 1
        "g1":  jnp.ones((1, HIDDEN), f32),
        "be1": jnp.zeros((1, HIDDEN), f32),
        # FFN
        "w1": scale * jax.random.normal(ks[3], (FFN_DIM, HIDDEN), f32),
        "b1": scale * jax.random.normal(ks[4], (1, FFN_DIM), f32),
        "w2": scale * jax.random.normal(ks[5], (HIDDEN, FFN_DIM), f32),
        "b2": jnp.zeros((1, HIDDEN), f32),
        # LayerNorm 2
        "g2":  jnp.ones((1, HIDDEN), f32),
        "be2": jnp.zeros((1, HIDDEN), f32),
    }


if __name__ == "__main__":
    key = jax.random.PRNGKey(0)
    pkey, xkey = jax.random.split(key)
    params = init_params(pkey)

    B, S = 2, 8
    x = jax.random.normal(xkey, (B, S, HIDDEN), jnp.float32)  # (batch, seq, hidden)

    out = jax.block_until_ready(multihead_attention_block(x, params))
    ref = jax.block_until_ready(reference_block(x, params))

    assert out.shape == (B, S, HIDDEN)
    # bf16 MXU operands with f32 accumulation -> compare against the f32 reference at 1e-2.
    assert jnp.allclose(out, ref, rtol=1e-2, atol=1e-2), "mismatch vs pure-JAX reference"
    print("KERNEL_OK")
</pallas_src>

<mosaic_0001>
module attributes {stable_mosaic.version = 11 : i64} {
  func.func @_mha_block_kernel(%arg0: i32, %arg1: memref<8x64xf32, #tpu.memory_space<vmem>>, %arg2: memref<64x64xbf16, #tpu.memory_space<vmem>>, %arg3: memref<1x64xf32, #tpu.memory_space<vmem>>, %arg4: memref<64x64xbf16, #tpu.memory_space<vmem>>, %arg5: memref<1x64xf32, #tpu.memory_space<vmem>>, %arg6: memref<64x64xbf16, #tpu.memory_space<vmem>>, %arg7: memref<1x64xf32, #tpu.memory_space<vmem>>, %arg8: memref<64x64xbf16, #tpu.memory_space<vmem>>, %arg9: memref<1x64xf32, #tpu.memory_space<vmem>>, %arg10: memref<1x64xf32, #tpu.memory_space<vmem>>, %arg11: memref<1x64xf32, #tpu.memory_space<vmem>>, %arg12: memref<64x256xbf16, #tpu.memory_space<vmem>>, %arg13: memref<1x256xf32, #tpu.memory_space<vmem>>, %arg14: memref<256x64xbf16, #tpu.memory_space<vmem>>, %arg15: memref<1x64xf32, #tpu.memory_space<vmem>>, %arg16: memref<1x64xf32, #tpu.memory_space<vmem>>, %arg17: memref<1x64xf32, #tpu.memory_space<vmem>>, %arg18: memref<8x64xf32, #tpu.memory_space<vmem>>) attributes {dimension_semantics = [#tpu.dimension_semantics<parallel>], iteration_bounds = array<i64: 2>, scalar_prefetch = 0 : i64, scratch_operands = 0 : i64, tpu.core_type = #tpu.core_type<tc>, window_params = [{transform_indices = @transform_0, window_bounds = array<i64: 8, 64>}, {pipeline_mode = #tpu.pipeline_mode<synchronous>, transform_indices = @transform_1, window_bounds = array<i64: 64, 64>}, {pipeline_mode = #tpu.pipeline_mode<synchronous>, transform_indices = @transform_2, window_bounds = array<i64: 1, 64>}, {pipeline_mode = #tpu.pipeline_mode<synchronous>, transform_indices = @transform_3, window_bounds = array<i64: 64, 64>}, {pipeline_mode = #tpu.pipeline_mode<synchronous>, transform_indices = @transform_4, window_bounds = array<i64: 1, 64>}, {pipeline_mode = #tpu.pipeline_mode<synchronous>, transform_indices = @transform_5, window_bounds = array<i64: 64, 64>}, {pipeline_mode = #tpu.pipeline_mode<synchronous>, transform_indices = @transform_6, window_bounds = array<i64: 1, 64>}, {pipeline_mode = #tpu.pipeline_mode<synchronous>, transform_indices = @transform_7, window_bounds = array<i64: 64, 64>}, {pipeline_mode = #tpu.pipeline_mode<synchronous>, transform_indices = @transform_8, window_bounds = array<i64: 1, 64>}, {pipeline_mode = #tpu.pipeline_mode<synchronous>, transform_indices = @transform_9, window_bounds = array<i64: 1, 64>}, {pipeline_mode = #tpu.pipeline_mode<synchronous>, transform_indices = @transform_10, window_bounds = array<i64: 1, 64>}, {pipeline_mode = #tpu.pipeline_mode<synchronous>, transform_indices = @transform_11, window_bounds = array<i64: 64, 256>}, {pipeline_mode = #tpu.pipeline_mode<synchronous>, transform_indices = @transform_12, window_bounds = array<i64: 1, 256>}, {pipeline_mode = #tpu.pipeline_mode<synchronous>, transform_indices = @transform_13, window_bounds = array<i64: 256, 64>}, {pipeline_mode = #tpu.pipeline_mode<synchronous>, transform_indices = @transform_14, window_bounds = array<i64: 1, 64>}, {pipeline_mode = #tpu.pipeline_mode<synchronous>, transform_indices = @transform_15, window_bounds = array<i64: 1, 64>}, {pipeline_mode = #tpu.pipeline_mode<synchronous>, transform_indices = @transform_16, window_bounds = array<i64: 1, 64>}, {transform_indices = @transform_17, window_bounds = array<i64: 8, 64>}]} {
    %c0 = arith.constant 0 : index
    %c0_0 = arith.constant 0 : index
    %0 = vector.load %arg1[%c0, %c0_0] : memref<8x64xf32, #tpu.memory_space<vmem>>, vector<8x64xf32>
    %1 = arith.truncf %0 : vector<8x64xf32> to vector<8x64xbf16>
    %c0_1 = arith.constant 0 : index
    %c0_2 = arith.constant 0 : index
    %2 = vector.load %arg2[%c0_1, %c0_2] : memref<64x64xbf16, #tpu.memory_space<vmem>>, vector<64x64xbf16>
    %cst = arith.constant dense<0.000000e+00> : vector<8x64xf32>
    %3 = tpu.matmul %1, %2, %cst {dimension_numbers = #tpu.dot_dimension_numbers<[1], [0], [0], [1], [0, 0, 1, 1], [], []>} : vector<8x64xbf16>, vector<64x64xbf16>, vector<8x64xf32> -> vector<8x64xf32>
    %c0_3 = arith.constant 0 : index
    %c0_4 = arith.constant 0 : index
    %4 = vector.load %arg3[%c0_3, %c0_4] : memref<1x64xf32, #tpu.memory_space<vmem>>, vector<1x64xf32>
    %5 = vector.broadcast %4 : vector<1x64xf32> to vector<8x64xf32>
    %6 = arith.addf %3, %5 : vector<8x64xf32>
    %7 = arith.truncf %6 : vector<8x64xf32> to vector<8x64xbf16>
    %8 = vector.shape_cast %7 : vector<8x64xbf16> to vector<1x8x64xbf16>
    %9 = tpu.transpose %8, [0, 2, 1] : vector<1x8x64xbf16> -> vector<1x64x8xbf16>
    %10 = vector.shape_cast %9 : vector<1x64x8xbf16> to vector<8x8x8xbf16>
    %c0_5 = arith.constant 0 : index
    %c0_6 = arith.constant 0 : index
    %11 = vector.load %arg4[%c0_5, %c0_6] : memref<64x64xbf16, #tpu.memory_space<vmem>>, vector<64x64xbf16>
    %cst_7 = arith.constant dense<0.000000e+00> : vector<8x64xf32>
    %12 = tpu.matmul %1, %11, %cst_7 {dimension_numbers = #tpu.dot_dimension_numbers<[1], [0], [0], [1], [0, 0, 1, 1], [], []>} : vector<8x64xbf16>, vector<64x64xbf16>, vector<8x64xf32> -> vector<8x64xf32>
    %c0_8 = arith.constant 0 : index
    %c0_9 = arith.constant 0 : index
    %13 = vector.load %arg5[%c0_8, %c0_9] : memref<1x64xf32, #tpu.memory_space<vmem>>, vector<1x64xf32>
    %14 = vector.broadcast %13 : vector<1x64xf32> to vector<8x64xf32>
    %15 = arith.addf %12, %14 : vector<8x64xf32>
    %16 = arith.truncf %15 : vector<8x64xf32> to vector<8x64xbf16>
    %17 = vector.shape_cast %16 : vector<8x64xbf16> to vector<1x8x64xbf16>
    %18 = tpu.transpose %17, [0, 2, 1] : vector<1x8x64xbf16> -> vector<1x64x8xbf16>
    %19 = vector.shape_cast %18 : vector<1x64x8xbf16> to vector<8x8x8xbf16>
    %c0_10 = arith.constant 0 : index
    %c0_11 = arith.constant 0 : index
    %20 = vector.load %arg6[%c0_10, %c0_11] : memref<64x64xbf16, #tpu.memory_space<vmem>>, vector<64x64xbf16>
    %cst_12 = arith.constant dense<0.000000e+00> : vector<8x64xf32>
    %21 = tpu.matmul %1, %20, %cst_12 {dimension_numbers = #tpu.dot_dimension_numbers<[1], [0], [0], [1], [0, 0, 1, 1], [], []>} : vector<8x64xbf16>, vector<64x64xbf16>, vector<8x64xf32> -> vector<8x64xf32>
    %c0_13 = arith.constant 0 : index
    %c0_14 = arith.constant 0 : index
    %22 = vector.load %arg7[%c0_13, %c0_14] : memref<1x64xf32, #tpu.memory_space<vmem>>, vector<1x64xf32>
    %23 = vector.broadcast %22 : vector<1x64xf32> to vector<8x64xf32>
    %24 = arith.addf %21, %23 : vector<8x64xf32>
    %25 = arith.truncf %24 : vector<8x64xf32> to vector<8x64xbf16>
    %26 = vector.shape_cast %25 : vector<8x64xbf16> to vector<1x8x64xbf16>
    %27 = tpu.transpose %26, [0, 2, 1] : vector<1x8x64xbf16> -> vector<1x64x8xbf16>
    %28 = vector.shape_cast %27 : vector<1x64x8xbf16> to vector<8x8x8xbf16>
    %29 = tpu.transpose %10, [0, 2, 1] : vector<8x8x8xbf16> -> vector<8x8x8xbf16>
    %30 = tpu.transpose %19, [0, 2, 1] : vector<8x8x8xbf16> -> vector<8x8x8xbf16>
    "tpu.trace_start"() <{level = 10 : i32, message = "bqd,bkd->bqk"}> : () -> ()
    %cst_15 = arith.constant dense<0.000000e+00> : vector<8x8x8xf32>
    %31 = tpu.matmul %29, %30, %cst_15 {dimension_numbers = #tpu.dot_dimension_numbers<[2], [2], [1], [1], [0, 0, 0, 1, 1, 1], [0], [0]>} : vector<8x8x8xbf16>, vector<8x8x8xbf16>, vector<8x8x8xf32> -> vector<8x8x8xf32>
    "tpu.trace_stop"() : () -> ()
    %cst_16 = arith.constant dense<0xFF800000> : vector<8x8xf32>
    %32 = vector.multi_reduction <maximumf>, %31, %cst_16 [2] : vector<8x8x8xf32> to vector<8x8xf32>
    %33 = vector.shape_cast %32 : vector<8x8xf32> to vector<8x8x1xf32>
    %34 = vector.broadcast %33 : vector<8x8x1xf32> to vector<8x8x8xf32>
    %35 = arith.subf %31, %34 : vector<8x8x8xf32>
    %36 = math.exp %35 : vector<8x8x8xf32>
    %cst_17 = arith.constant dense<0.000000e+00> : vector<8x8xf32>
    %37 = vector.multi_reduction <add>, %36, %cst_17 [2] : vector<8x8x8xf32> to vector<8x8xf32>
    %38 = vector.shape_cast %37 : vector<8x8xf32> to vector<8x8x1xf32>
    %cst_18 = arith.constant 1.000000e+00 : f32
    %39 = vector.broadcast %cst_18 : f32 to vector<8x8x1xf32>
    %40 = arith.divf %39, %38 : vector<8x8x1xf32>
    %41 = vector.broadcast %40 : vector<8x8x1xf32> to vector<8x8x8xf32>
    %42 = arith.mulf %36, %41 : vector<8x8x8xf32>
    %43 = arith.truncf %42 : vector<8x8x8xf32> to vector<8x8x8xbf16>
    "tpu.trace_start"() <{level = 10 : i32, message = "bdk,bqk->bdq"}> : () -> ()
    %cst_19 = arith.constant dense<0.000000e+00> : vector<8x8x8xf32>
    %44 = tpu.matmul %28, %43, %cst_19 {dimension_numbers = #tpu.dot_dimension_numbers<[2], [2], [1], [1], [0, 0, 0, 1, 1, 1], [0], [0]>} : vector<8x8x8xbf16>, vector<8x8x8xbf16>, vector<8x8x8xf32> -> vector<8x8x8xf32>
    "tpu.trace_stop"() : () -> ()
    %45 = vector.shape_cast %44 : vector<8x8x8xf32> to vector<1x64x8xf32>
    %46 = tpu.transpose %45, [0, 2, 1] : vector<1x64x8xf32> -> vector<1x8x64xf32>
    %47 = vector.shape_cast %46 : vector<1x8x64xf32> to vector<8x64xf32>
    %48 = arith.truncf %47 : vector<8x64xf32> to vector<8x64xbf16>
    %c0_20 = arith.constant 0 : index
    %c0_21 = arith.constant 0 : index
    %49 = vector.load %arg8[%c0_20, %c0_21] : memref<64x64xbf16, #tpu.memory_space<vmem>>, vector<64x64xbf16>
    %cst_22 = arith.constant dense<0.000000e+00> : vector<8x64xf32>
    %50 = tpu.matmul %48, %49, %cst_22 {dimension_numbers = #tpu.dot_dimension_numbers<[1], [0], [0], [1], [0, 0, 1, 1], [], []>} : vector<8x64xbf16>, vector<64x64xbf16>, vector<8x64xf32> -> vector<8x64xf32>
    %c0_23 = arith.constant 0 : index
    %c0_24 = arith.constant 0 : index
    %51 = vector.load %arg9[%c0_23, %c0_24] : memref<1x64xf32, #tpu.memory_space<vmem>>, vector<1x64xf32>
    %52 = vector.broadcast %51 : vector<1x64xf32> to vector<8x64xf32>
    %53 = arith.addf %50, %52 : vector<8x64xf32>
    %54 = arith.addf %0, %53 : vector<8x64xf32>
    %c0_25 = arith.constant 0 : index
    %c0_26 = arith.constant 0 : index
    %55 = vector.load %arg10[%c0_25, %c0_26] : memref<1x64xf32, #tpu.memory_space<vmem>>, vector<1x64xf32>
    %c0_27 = arith.constant 0 : index
    %c0_28 = arith.constant 0 : index
    %56 = vector.load %arg11[%c0_27, %c0_28] : memref<1x64xf32, #tpu.memory_space<vmem>>, vector<1x64xf32>
    %cst_29 = arith.constant dense<0.000000e+00> : vector<8xf32>
    %57 = vector.multi_reduction <add>, %54, %cst_29 [1] : vector<8x64xf32> to vector<8xf32>
    %58 = vector.shape_cast %57 : vector<8xf32> to vector<8x1xf32>
    %cst_30 = arith.constant 6.400000e+01 : f32
    %59 = vector.broadcast %cst_30 : f32 to vector<8x1xf32>
    %60 = arith.divf %58, %59 : vector<8x1xf32>
    %61 = vector.broadcast %60 : vector<8x1xf32> to vector<8x64xf32>
    %62 = arith.subf %54, %61 : vector<8x64xf32>
    %63 = arith.mulf %62, %62 : vector<8x64xf32>
    %cst_31 = arith.constant dense<0.000000e+00> : vector<8xf32>
    %64 = vector.multi_reduction <add>, %63, %cst_31 [1] : vector<8x64xf32> to vector<8xf32>
    %65 = vector.shape_cast %64 : vector<8xf32> to vector<8x1xf32>
    %cst_32 = arith.constant 6.400000e+01 : f32
    %66 = vector.broadcast %cst_32 : f32 to vector<8x1xf32>
    %67 = arith.divf %65, %66 : vector<8x1xf32>
    %68 = vector.broadcast %60 : vector<8x1xf32> to vector<8x64xf32>
    %69 = arith.subf %54, %68 : vector<8x64xf32>
    %cst_33 = arith.constant 9.99999974E-6 : f32
    %70 = vector.broadcast %cst_33 : f32 to vector<8x1xf32>
    %71 = arith.addf %67, %70 : vector<8x1xf32>
    %72 = math.rsqrt %71 : vector<8x1xf32>
    %73 = vector.broadcast %72 : vector<8x1xf32> to vector<8x64xf32>
    %74 = arith.mulf %69, %73 : vector<8x64xf32>
    %75 = vector.broadcast %55 : vector<1x64xf32> to vector<8x64xf32>
    %76 = arith.mulf %74, %75 : vector<8x64xf32>
    %77 = vector.broadcast %56 : vector<1x64xf32> to vector<8x64xf32>
    %78 = arith.addf %76, %77 : vector<8x64xf32>
    %79 = arith.truncf %78 : vector<8x64xf32> to vector<8x64xbf16>
    %c0_34 = arith.constant 0 : index
    %c0_35 = arith.constant 0 : index
    %80 = vector.load %arg12[%c0_34, %c0_35] : memref<64x256xbf16, #tpu.memory_space<vmem>>, vector<64x256xbf16>
    %cst_36 = arith.constant dense<0.000000e+00> : vector<8x256xf32>
    %81 = tpu.matmul %79, %80, %cst_36 {dimension_numbers = #tpu.dot_dimension_numbers<[1], [0], [0], [1], [0, 0, 1, 1], [], []>} : vector<8x64xbf16>, vector<64x256xbf16>, vector<8x256xf32> -> vector<8x256xf32>
    %c0_37 = arith.constant 0 : index
    %c0_38 = arith.constant 0 : index
    %82 = vector.load %arg13[%c0_37, %c0_38] : memref<1x256xf32, #tpu.memory_space<vmem>>, vector<1x256xf32>
    %83 = vector.broadcast %82 : vector<1x256xf32> to vector<8x256xf32>
    %84 = arith.addf %81, %83 : vector<8x256xf32>
    %cst_39 = arith.constant 0.000000e+00 : f32
    %85 = vector.broadcast %cst_39 : f32 to vector<8x256xf32>
    %86 = arith.cmpf ogt, %84, %85 : vector<8x256xf32>
    %cst_40 = arith.constant 0.00999999977 : f32
    %87 = vector.broadcast %cst_40 : f32 to vector<8x256xf32>
    %88 = arith.mulf %87, %84 : vector<8x256xf32>
    %89 = arith.select %86, %84, %88 : vector<8x256xi1>, vector<8x256xf32>
    %90 = arith.truncf %89 : vector<8x256xf32> to vector<8x256xbf16>
    %c0_41 = arith.constant 0 : index
    %c0_42 = arith.constant 0 : index
    %91 = vector.load %arg14[%c0_41, %c0_42] : memref<256x64xbf16, #tpu.memory_space<vmem>>, vector<256x64xbf16>
    %cst_43 = arith.constant dense<0.000000e+00> : vector<8x64xf32>
    %92 = tpu.matmul %90, %91, %cst_43 {dimension_numbers = #tpu.dot_dimension_numbers<[1], [0], [0], [1], [0, 0, 1, 1], [], []>} : vector<8x256xbf16>, vector<256x64xbf16>, vector<8x64xf32> -> vector<8x64xf32>
    %c0_44 = arith.constant 0 : index
    %c0_45 = arith.constant 0 : index
    %93 = vector.load %arg15[%c0_44, %c0_45] : memref<1x64xf32, #tpu.memory_space<vmem>>, vector<1x64xf32>
    %94 = vector.broadcast %93 : vector<1x64xf32> to vector<8x64xf32>
    %95 = arith.addf %92, %94 : vector<8x64xf32>
    %96 = arith.addf %78, %95 : vector<8x64xf32>
    %c0_46 = arith.constant 0 : index
    %c0_47 = arith.constant 0 : index
    %97 = vector.load %arg16[%c0_46, %c0_47] : memref<1x64xf32, #tpu.memory_space<vmem>>, vector<1x64xf32>
    %c0_48 = arith.constant 0 : index
    %c0_49 = arith.constant 0 : index
    %98 = vector.load %arg17[%c0_48, %c0_49] : memref<1x64xf32, #tpu.memory_space<vmem>>, vector<1x64xf32>
    %cst_50 = arith.constant dense<0.000000e+00> : vector<8xf32>
    %99 = vector.multi_reduction <add>, %96, %cst_50 [1] : vector<8x64xf32> to vector<8xf32>
    %100 = vector.shape_cast %99 : vector<8xf32> to vector<8x1xf32>
    %cst_51 = arith.constant 6.400000e+01 : f32
    %101 = vector.broadcast %cst_51 : f32 to vector<8x1xf32>
    %102 = arith.divf %100, %101 : vector<8x1xf32>
    %103 = vector.broadcast %102 : vector<8x1xf32> to vector<8x64xf32>
    %104 = arith.subf %96, %103 : vector<8x64xf32>
    %105 = arith.mulf %104, %104 : vector<8x64xf32>
    %cst_52 = arith.constant dense<0.000000e+00> : vector<8xf32>
    %106 = vector.multi_reduction <add>, %105, %cst_52 [1] : vector<8x64xf32> to vector<8xf32>
    %107 = vector.shape_cast %106 : vector<8xf32> to vector<8x1xf32>
    %cst_53 = arith.constant 6.400000e+01 : f32
    %108 = vector.broadcast %cst_53 : f32 to vector<8x1xf32>
    %109 = arith.divf %107, %108 : vector<8x1xf32>
    %110 = vector.broadcast %102 : vector<8x1xf32> to vector<8x64xf32>
    %111 = arith.subf %96, %110 : vector<8x64xf32>
    %cst_54 = arith.constant 9.99999974E-6 : f32
    %112 = vector.broadcast %cst_54 : f32 to vector<8x1xf32>
    %113 = arith.addf %109, %112 : vector<8x1xf32>
    %114 = math.rsqrt %113 : vector<8x1xf32>
    %115 = vector.broadcast %114 : vector<8x1xf32> to vector<8x64xf32>
    %116 = arith.mulf %111, %115 : vector<8x64xf32>
    %117 = vector.broadcast %97 : vector<1x64xf32> to vector<8x64xf32>
    %118 = arith.mulf %116, %117 : vector<8x64xf32>
    %119 = vector.broadcast %98 : vector<1x64xf32> to vector<8x64xf32>
    %120 = arith.addf %118, %119 : vector<8x64xf32>
    %c0_55 = arith.constant 0 : index
    %c0_56 = arith.constant 0 : index
    %121 = vector.load %arg18[%c0_55, %c0_56] : memref<8x64xf32, #tpu.memory_space<vmem>>, vector<8x64xf32>
    tpu.vector_store %arg18[%c0_55, %c0_56], %120 {strides = array<i32>} : memref<8x64xf32, #tpu.memory_space<vmem>>, vector<8x64xf32>,
    return
  }
  func.func @transform_0(%arg0: i32) -> (i32, i32) {
    %c0_i32 = arith.constant 0 : i32
    %c0_i32_0 = arith.constant 0 : i32
    return %arg0, %c0_i32 : i32, i32
  }
  func.func @transform_1(%arg0: i32) -> (i32, i32) {
    %c0_i32 = arith.constant 0 : i32
    %c0_i32_0 = arith.constant 0 : i32
    %c0_i32_1 = arith.constant 0 : i32
    return %c0_i32, %c0_i32_0 : i32, i32
  }
  func.func @transform_2(%arg0: i32) -> (i32, i32) {
    %c0_i32 = arith.constant 0 : i32
    %c0_i32_0 = arith.constant 0 : i32
    %c0_i32_1 = arith.constant 0 : i32
    return %c0_i32, %c0_i32_0 : i32, i32
  }
  func.func @transform_3(%arg0: i32) -> (i32, i32) {
    %c0_i32 = arith.constant 0 : i32
    %c0_i32_0 = arith.constant 0 : i32
    %c0_i32_1 = arith.constant 0 : i32
    return %c0_i32, %c0_i32_0 : i32, i32
  }
  func.func @transform_4(%arg0: i32) -> (i32, i32) {
    %c0_i32 = arith.constant 0 : i32
    %c0_i32_0 = arith.constant 0 : i32
    %c0_i32_1 = arith.constant 0 : i32
    return %c0_i32, %c0_i32_0 : i32, i32
  }
  func.func @transform_5(%arg0: i32) -> (i32, i32) {
    %c0_i32 = arith.constant 0 : i32
    %c0_i32_0 = arith.constant 0 : i32
    %c0_i32_1 = arith.constant 0 : i32
    return %c0_i32, %c0_i32_0 : i32, i32
  }
  func.func @transform_6(%arg0: i32) -> (i32, i32) {
    %c0_i32 = arith.constant 0 : i32
    %c0_i32_0 = arith.constant 0 : i32
    %c0_i32_1 = arith.constant 0 : i32
    return %c0_i32, %c0_i32_0 : i32, i32
  }
  func.func @transform_7(%arg0: i32) -> (i32, i32) {
    %c0_i32 = arith.constant 0 : i32
    %c0_i32_0 = arith.constant 0 : i32
    %c0_i32_1 = arith.constant 0 : i32
    return %c0_i32, %c0_i32_0 : i32, i32
  }
  func.func @transform_8(%arg0: i32) -> (i32, i32) {
    %c0_i32 = arith.constant 0 : i32
    %c0_i32_0 = arith.constant 0 : i32
    %c0_i32_1 = arith.constant 0 : i32
    return %c0_i32, %c0_i32_0 : i32, i32
  }
  func.func @transform_9(%arg0: i32) -> (i32, i32) {
    %c0_i32 = arith.constant 0 : i32
    %c0_i32_0 = arith.constant 0 : i32
    %c0_i32_1 = arith.constant 0 : i32
    return %c0_i32, %c0_i32_0 : i32, i32
  }
  func.func @transform_10(%arg0: i32) -> (i32, i32) {
    %c0_i32 = arith.constant 0 : i32
    %c0_i32_0 = arith.constant 0 : i32
    %c0_i32_1 = arith.constant 0 : i32
    return %c0_i32, %c0_i32_0 : i32, i32
  }
  func.func @transform_11(%arg0: i32) -> (i32, i32) {
    %c0_i32 = arith.constant 0 : i32
    %c0_i32_0 = arith.constant 0 : i32
    %c0_i32_1 = arith.constant 0 : i32
    return %c0_i32, %c0_i32_0 : i32, i32
  }
  func.func @transform_12(%arg0: i32) -> (i32, i32) {
    %c0_i32 = arith.constant 0 : i32
    %c0_i32_0 = arith.constant 0 : i32
    %c0_i32_1 = arith.constant 0 : i32
    return %c0_i32, %c0_i32_0 : i32, i32
  }
  func.func @transform_13(%arg0: i32) -> (i32, i32) {
    %c0_i32 = arith.constant 0 : i32
    %c0_i32_0 = arith.constant 0 : i32
    %c0_i32_1 = arith.constant 0 : i32
    return %c0_i32, %c0_i32_0 : i32, i32
  }
  func.func @transform_14(%arg0: i32) -> (i32, i32) {
    %c0_i32 = arith.constant 0 : i32
    %c0_i32_0 = arith.constant 0 : i32
    %c0_i32_1 = arith.constant 0 : i32
    return %c0_i32, %c0_i32_0 : i32, i32
  }
  func.func @transform_15(%arg0: i32) -> (i32, i32) {
    %c0_i32 = arith.constant 0 : i32
    %c0_i32_0 = arith.constant 0 : i32
    %c0_i32_1 = arith.constant 0 : i32
    return %c0_i32, %c0_i32_0 : i32, i32
  }
  func.func @transform_16(%arg0: i32) -> (i32, i32) {
    %c0_i32 = arith.constant 0 : i32
    %c0_i32_0 = arith.constant 0 : i32
    %c0_i32_1 = arith.constant 0 : i32
    return %c0_i32, %c0_i32_0 : i32, i32
  }
  func.func @transform_17(%arg0: i32) -> (i32, i32) {
    %c0_i32 = arith.constant 0 : i32
    %c0_i32_0 = arith.constant 0 : i32
    return %arg0, %c0_i32 : i32, i32
  }
}

</mosaic_0001>

<bundles_post_ra>
// kernel: tpu_custom_call.1
= control target key start
LH: loop header
LB: loop body
LE: loop exit
PB: predicated region body
PF: predicated region fallthrough
CT: control target
= control target key end

     0   :  { %s3561_s0 = inlined_call_operand.hbm [shape: f32[16,64], index: 0, kind: input, shape index: {}]   ;;  %s3562_s1 = inlined_call_operand.vmem [shape: bf16[64,64], index: 1, kind: input, shape index: {}]   ;;  %s3563_s2 = inlined_call_operand.vmem [shape: f32[1,64], index: 2, kind: input, shape index: {}]   ;;  %s3564_s3 = inlined_call_operand.vmem [shape: bf16[64,64], index: 3, kind: input, shape index: {}]   ;;  %s3565_s4 = inlined_call_operand.vmem [shape: f32[1,64], index: 4, kind: input, shape index: {}]   ;;  %s3566_s5 = inlined_call_operand.vmem [shape: bf16[64,64], index: 5, kind: input, shape index: {}]   ;;  %s3567_s6 = inlined_call_operand.vmem [shape: f32[1,64], index: 6, kind: input, shape index: {}]   ;;  %s3568_s7 = inlined_call_operand.vmem [shape: bf16[64,64], index: 7, kind: input, shape index: {}]   ;;  %s3569_s8 = inlined_call_operand.vmem [shape: f32[1,64], index: 8, kind: input, shape index: {}]   ;;  %s3570_s9 = inlined_call_operand.vmem [shape: f32[1,64], index: 9, kind: input, shape index: {}]   ;;  %s3571_s10 = inlined_call_operand.vmem [shape: f32[1,64], index: 10, kind: input, shape index: {}]   ;;  %s3572_s11 = inlined_call_operand.vmem [shape: bf16[64,256], index: 11, kind: input, shape index: {}]   ;;  %s3573_s12 = inlined_call_operand.vmem [shape: f32[1,256], index: 12, kind: input, shape index: {}]   ;;  %s3574_s13 = inlined_call_operand.vmem [shape: bf16[256,64], index: 13, kind: input, shape index: {}]   ;;  %s3575_s14 = inlined_call_operand.vmem [shape: f32[1,64], index: 14, kind: input, shape index: {}]   ;;  %s3576_s15 = inlined_call_operand.vmem [shape: f32[1,64], index: 15, kind: input, shape index: {}]   ;;  %s3577_s16 = inlined_call_operand.vmem [shape: f32[1,64], index: 16, kind: input, shape index: {}]   ;;  %s3578_s17 = inlined_call_operand.hbm [shape: f32[16,64], index: 17, kind: output, shape index: {}]  }
   0x1   :  { %3590 = sst [smem:[#allocation12_spill]] %s3561_s0 }
   0x2   :  { %3591 = sst [smem:[#allocation13_spill]] %s3562_s1 }
   0x3   :  { %3592 = sst [smem:[#allocation14_spill]] %s3563_s2 }
   0x4   :  { %3593 = sst [smem:[#allocation15_spill]] %s3564_s3 }
   0x5   :  { %3594 = sst [smem:[#allocation16_spill]] %s3565_s4 }
   0x6   :  { %3595 = sst [smem:[#allocation17_spill]] %s3566_s5 }
   0x7   :  { %3596 = sst [smem:[#allocation18_spill]] %s3576_s15 }
   0x8   :  { %3597 = sst [smem:[#allocation19_spill]] %s3577_s16 }
   0x9   :  { %3598 = sst [smem:[#allocation20_spill]] %s3578_s17 }
   0xa   :  { %22 = vsyncpa [#allocation3], 0 }
   0xb   :  { %24 = vsyncpa [#allocation3 + $0x1], 0 }
   0xc   :  { %25 = vsyncpa [#allocation4], 0 }
   0xd   :  { %27 = vsyncpa [#allocation4 + $0x1], 0  ;;  %s3092_s24 = smov 0   ;;  %s3094_s25 = smov 0  }
   0xe   :  { %s3096_s26 = smov 0   ;;  %s3098_s27 = smov 0  }
   0xf LB: > { %3599 = sst [smem:[#allocation8_spill]] %s2983_s24  ;;  %s3113_s28 = sadd.s32 4294967295, %s2995_s27   ;;  %s2995_s27 = sphi %s3098_s27, %s3626_s27   ;;  %s2991_s26 = sphi %s3096_s26, %s3630_s26   ;;  %s2987_s25 = sphi %s3094_s25, %s3629_s25   ;;  %s2983_s24 = sphi %s3092_s24, %s3628_s24  }
  0x10   : > { %s2446_s29 = sadd.s32 4294967294, %s2995_s27   ;;  %s3117_s0 = sadd.s32 1, %s2995_s27  }
  0x11   : > { %3600 = sst [smem:[#allocation9_spill]] %s3117_s0  ;;  %s40_s30 = sadd.s32 1, %s2991_s26 }
  0x12   : > { %s37_s18 = ssub.s32 %s2995_s27, %s3117_s0  ;;  %p47_p0 = scmp.ne.s32.totalorder %s2991_s26, %s2987_s25 }
  0x13   : > { %p38_p1 = scmp.eq.s32.totalorder %s37_s18, 0  ;;  %p48_p2 = scmp.eq.s32.totalorder %s2995_s27, 0 }
  0x14   : > { %p53_p3 = scmp.ne.s32.totalorder %s2987_s25, %s2983_s24  ;;  %p54_p4 = scmp.eq.s32.totalorder %s3113_s28, 0 }
  0x15   : > { %s3129_s19 = scalar_select %p38_p1, %s2991_s26, %s40_s30  }
  0x16   : > { %p3131_p5 = por %p48_p2, %p47_p0  ;;  %p3135_p6 = por %p54_p4, %p53_p3 }
  0x17   : > { %3601 = sst [smem:[#allocation10_spill]] %s3129_s19  ;;  %p413_p7 = scmp.eq.s32.totalorder %s3113_s28, 1 }
  0x18   : > { %p419_p8 = scmp.eq.s32.totalorder %s2446_s29, 1  ;;  %p2782_p10 = scmp.lt.s32.totalorder %s2995_s27, 2 }
  0x19   : > { %p3142_p11 = por %p413_p7, %p47_p0  ;;  %s487_s23 = sand.u32 1, %s2991_s26  }
  0x1a   : > { %p3146_p12 = por %p419_p8, %p53_p3  ;;  %s2450_s30 = sshll.u32 %s2995_s27, 7 }
  0x1b   : > { %s3604_s21 = scalar_select %p3142_p11, 1, 0 }
  0x1c   : > { %s3606_s22 = scalar_select %p3146_p12, 1, 0 }
  0x1d   : > { %3605 = sst [smem:[#allocation11_spill]] %s3604_s21  ;;  %s2449_s18 = sshll.u32 %s487_s23, 3 }
  0x1e   : > { %s3607_s24 = sld [smem:[#allocation12_spill]]  ;;  %s491_s29 = scalar_lea.vmem [#allocation2], %s2449_s18 }
  0x1f   : > { %s498_s15 = sshll.u32 %s491_s29, 4  ;;  %p3159_p13 = pnand %p2782_p10, %p3131_p5  ;;  %s3163_s15 = int_to_ptr.vmem [resolvable:$true] %s498_s15 }
  0x20   : > { %s488_s0 = scalar_lea.sflag [#allocation3], %s487_s23 }
  0x21   : > { %p2901_p3 = pneg %p3159_p13 }
  0x24   : > { %s3608_s17 = smov %s3607_s24  ;;  %s3155_s16 = scalar_lea.hbm %s3607_s24, %s2450_s30 }
  0x25   : > { %s2899_s24 = scalar_lea.hbm %s3155_s16, 128  ;;  %s2904_s30 = scalar_lea.hbm %s3608_s17, 256 }
  0x26   : > { %p2900_p2 = scmp.ne.s32.totalorder %s3155_s16, %s2899_s24  ;;  %p2905_p5 = scmp.lt.u32.totalorder %s3155_s16, %s3608_s17 }
  0x27   : > { %p2906_p8 = scmp.lt.u32.totalorder %s2904_s30, %s2899_s24  ;;  %p2908_p9 = scmp.lt.u32.totalorder %s2899_s24, %s3155_s16 }
  0x28   : > { %p2902_p4 = pnand %p2901_p3, %p2900_p2 }
  0x29   : > { %p2907_p10 = por %p2906_p8, %p2905_p5 }
  0x2a   : > { %p2903_p7 = pneg %p2902_p4 }
  0x2b   : > { %p2909_p0 = por %p2908_p9, %p2907_p10 }
  0x2d   : > { %p2910_p1 = pnand %p2909_p0, %p2903_p7 }
  0x2f   : > { %2913 = shalt.err (!%p2910_p1)
}
  0x30   : > { %s2914_s23 = scalar_lea.vmem %s3163_s15, 128  ;;  %s2997_s19 = smov [#allocation2]  }
  0x31   : > { %p2915_p2 = scmp.ne.s32.totalorder %s3163_s15, %s2914_s23  ;;  %s2919_s1 = sshll.u32 %s2997_s19, 4  ;;  %s2920_s1 = int_to_ptr.vmem [resolvable:$false] %s2919_s1 }
  0x32   : > { %s2921_s18 = scalar_lea.vmem %s2920_s1, 256  ;;  %p2922_p11 = scmp.lt.s32.totalorder %s3163_s15, %s2920_s1 }
  0x33   : > { %p2917_p4 = pnand %p2915_p2, %p2901_p3  ;;  %p2923_p5 = scmp.lt.s32.totalorder %s2921_s18, %s2914_s23 }
  0x35   : > { %p2918_p12 = pneg %p2917_p4  ;;  %p2924_p8 = por %p2923_p5, %p2922_p11 }
  0x37   : > { %p2925_p9 = pnand %p2924_p8, %p2918_p12 }
  0x39   : > { %2928 = shalt.err (!%p2925_p9)
}
  0x3a   : > { %2777 = dma.hbm_to_vmem [thread:$0]  (!%p3159_p13), %s3155_s16, 128, %s3163_s15, %s488_s0  }
  0x3b   : > { %p3610_p0 = scmp.lt.s32.totalorder %s2995_s27, 3  ;;  %p3611_p1 = scmp.ge.s32.totalorder %s2995_s27, 1 }
  0x3d   : > { %p504_p3 = pnand %p3611_p1, %p3610_p0 }
  0x3e   : > { %s3197_s24 = sand.u32 (!%p504_p3), 1, %s2987_s25  }
  0x3f   : > { %507 = sbr.rel (%p504_p3) target bundleno = 2703 (0xa8f), region = 88  ;;  %s3588_s30 = sshll.u32 (!%p504_p3), %s3197_s24, 3 }
  0x40   : > { %s510_s29 = scalar_lea.sflag (!%p504_p3), [#allocation3], %s3197_s24  ;;  %s513_s21 = scalar_lea.vmem (!%p504_p3), [#allocation2], %s3588_s30 }
  0x46   : > { %2974 = dma.done.wait (%p3135_p6), %s510_s29, 128  }
  0x47   : > { %2976 = vsyncadd (%p3135_p6), %s510_s29, 4294967168  ;;  %v2998_v0 = vmov 0.0   ;;  %vm2999_vm0 = vmmov 0   ;;  %s3612_s0 = sld [smem:[#allocation13_spill]]  ;;  %v3227_v5 = vld [vmem:[%s513_s21] sm:$0xff]  ;;  %s3613_s3 = sld [smem:[#allocation15_spill]] }
  0x48   : > { %2626 = vmatprep.subr.bf16.mxu1 %v2998_v0  ;;  %2634 = vmatprep.mubr.msk.bf16.mxu1 %vm2999_vm0, %v2998_v0  ;;  %v566_v7 = vpack.c.bf16 %v3227_v5, %v3227_v5  ;;  %vm606_vm1 = vcmask 523264   ;;  %s3614_s2 = sld [smem:[#allocation14_spill]]  ;;  %s3615_s5 = sld [smem:[#allocation17_spill]]  ;;  %vm1059_vm2 = vcmask 1043456   ;;  %vm1055_vm3 = vcmask 64512  }
  0x49   : > { %2650 = vmatprep.subr.bf16.mxu0 %v2998_v0  ;;  %2658 = vmatprep.mubr.msk.bf16.mxu0 %vm2999_vm0, %v2998_v0  ;;  %s3616_s4 = sld [smem:[#allocation16_spill]]  ;;  %s3618_s21 = sld [smem:[#allocation18_spill]] }
  0x4a   : > { %s3617_s30 = sld [smem:[#allocation11_spill]]  ;;  %s3619_s18 = sld [smem:[#allocation19_spill]] }
  0x4b   : > { %s2549_s29 = sshll.u32 %s3113_s28, 7  ;;  %s3620_s15 = sshll.u32 %s3197_s24, 3 }
  0x4c   : > { %s563_s16 = scalar_lea.vmem [#allocation5], %s3620_s15  ;;  %s2363_s23 = scalar_lea.sflag [#allocation4], %s3197_s24 }
  0x4d   : > { %v2819_v1 = vld [vmem:[%s3612_s0] sm:$0xff]   ;;  %v2820_v2 = vld [vmem:[%s3612_s0 + $0x8] sm:$0xff]   ;;  %v2821_v3 = vld [vmem:[%s3612_s0 + $0x10] sm:$0xff]   ;;  %s3001_s28 = smov [#allocation5]  }
  0x4e   : > { %2627 = vmatpush3.bf16.msra.mxu1 %v2819_v1  ;;  %v2822_v4 = vld [vmem:[%s3612_s0 + $0x18] sm:$0xff]   ;;  %v2823_v6 = vld [vmem:[%s3613_s3] sm:$0xff]   ;;  %v2824_v8 = vld [vmem:[%s3613_s3 + $0x8] sm:$0xff]   ;;  %s2376_s0 = sshll.u32 %s563_s16, 4  ;;  %s3518_s0 = int_to_ptr.vmem [resolvable:$true] %s2376_s0 }
  0x4f   : > { %2628 = vmatprep.subr.bf16.mxu1 %v2998_v0  ;;  %v2825_v9 = vld [vmem:[%s3613_s3 + $0x10] sm:$0xff]   ;;  %v2826_v10 = vld [vmem:[%s3613_s3 + $0x18] sm:$0xff]   ;;  %v2454_v11 = vld [vmem:[%s3614_s2] ss:$0 sm:$0xff]  ;;  %s2929_s20 = scalar_lea.vmem %s3518_s0, 128 }
  0x50   : > { %v2827_v18 = vld [vmem:[%s3615_s5] sm:$0xff]   ;;  %v2828_v19 = vld [vmem:[%s3615_s5 + $0x8] sm:$0xff]   ;;  %v2829_v20 = vld [vmem:[%s3615_s5 + $0x10] sm:$0xff]   ;;  %p2930_p6 = scmp.ne.s32.totalorder %s3518_s0, %s2929_s20  ;;  %p3622_p11 = scmp.ne.s32.totalorder %s3617_s30, 0 }
  0x51   : > { %2651 = vmatpush3.bf16.msra.mxu0 %v2827_v18  ;;  %v2468_v21 = vld [vmem:[%s3616_s4] ss:$0 sm:$0xff]  ;;  %v2830_v23 = vld [vmem:[%s3615_s5 + $0x18] sm:$0xff]   ;;  %s3621_s4 = sld [smem:[#allocation20_spill]] }
  0x52   : > { %2629 = vmatpush3.bf16.msra.mxu1 %v2820_v2  ;;  %2652 = vmatprep.subr.bf16.mxu0 %v2998_v0  ;;  %p2931_p12 = pnand %p2930_p6, %p3622_p11 }
  0x53   : > { %2630 = vmatprep.subr.bf16.mxu1 %v2998_v0 }
  0x54   : > { %p2932_p13 = pneg %p2931_p12 }
  0x55   : > { %2653 = vmatpush3.bf16.msra.mxu0 %v2828_v19 }
  0x56   : > { %2631 = vmatpush3.bf16.msra.mxu1 %v2821_v3  ;;  %2654 = vmatprep.subr.bf16.mxu0 %v2998_v0 }
  0x57   : > { %2632 = vmatprep.subr.bf16.mxu1 %v2998_v0  ;;  %s3516_s5 = scalar_lea.hbm %s3621_s4, %s2549_s29 }
  0x59   : > { %2655 = vmatpush3.bf16.msra.mxu0 %v2829_v20 }
  0x5a   : > { %2633 = vmatpush3.bf16.msra.mxu1 %v2822_v4  ;;  %2656 = vmatprep.subr.bf16.mxu0 %v2998_v0 }
  0x5b   : > { %2638 = vmatprep.subr.bf16.mxu1 %v2998_v0 }
  0x5d   : > { %2635 = vmatmul.mubr.msk.bf16.vlgmr.msra.gmra.mrb[0].mxu1 %vm606_vm1, %v566_v7  ;;  %2657 = vmatpush3.bf16.msra.mxu0 %v2830_v23 }
  0x5e   : > { %2639 = vmatpush3.bf16.msra.mxu1 %v2823_v6  ;;  %2646 = vmatprep.mubr.msk.bf16.mxu1 %vm2999_vm0, %v2998_v0 }
  0x5f   : > { %2640 = vmatprep.subr.bf16.mxu1 %v2998_v0  ;;  %2674 = vmatprep.subr.bf16.mxu0 %v2998_v0 }
  0x60   : > { %2659 = vmatmul.mubr.msk.bf16.vlgmr.msra.gmra.mrb[0].mxu0 %vm606_vm1, %v566_v7 }
  0x61   : > { %2676 = vmatprep.mubr.msk.bf16.mxu0 %vm2999_vm0, %v2998_v0 }
  0x62   : > { %2641 = vmatpush3.bf16.msra.mxu1 %v2824_v8 }
  0x63   : > { %2642 = vmatprep.subr.bf16.mxu1 %v2998_v0 }
  0x66   : > { %2643 = vmatpush3.bf16.msra.mxu1 %v2825_v9 }
  0x67   : > { %2644 = vmatprep.subr.bf16.mxu1 %v2998_v0 }
  0x6a   : > { %2645 = vmatpush3.bf16.msra.mxu1 %v2826_v10 }
  0x6b   : > { %2662 = vmatprep.subr.bf16.mxu1 %v2998_v0 }
  0x6d   : > { %2647 = vmatmul.mubr.msk.bf16.vlgmr.msra.gmra.mrb[4].mxu1 %vm606_vm1, %v566_v7 }
  0x6e   : > { %2664 = vmatprep.mubr.msk.bf16.mxu1 %vm2999_vm0, %v2998_v0 }
 0x130   : > { %v644_v12 = vpop.f32.mrb[0].mxu1 }
 0x131   : > { %v2636_v13 = vpop.f32.mrb[1].mxu1  ;;  %v645_v14 = vadd.f32 %v2454_v11, %v644_v12 }
 0x132   : > { %v647_v15 = vpop.f32.mrb[2].mxu1 }
 0x133   : > { %v2637_v16 = vpop.f32.mrb[3].mxu1  ;;  %v650_v17 = vpack.c.bf16 %v645_v14, %v645_v14  ;;  %v3309_v4 = vpop.f32.mrb[0].mxu0 }
 0x134   : > { %v2660_v6 = vpop.f32.mrb[1].mxu0 }
 0x135   : > { %651 = vxpose.xlu0.c.b16.start.end [1/1] (short) (narrow) %v650_v17, 64  ;;  %v887_v7 = vpop.f32.mrb[2].mxu0 }
 0x136   : > { %v2661_v9 = vpop.f32.mrb[3].mxu0 }
 0x140   : > { %v768_v22 = vpop.f32.mrb[4].mxu1 }
 0x141   : > { %v769_v24 = vadd.f32 %v2468_v21, %v768_v22  ;;  %v2648_v25 = vpop.f32.mrb[5].mxu1 }
 0x142   : > { %v771_v26 = vpop.f32.mrb[6].mxu1 }
 0x143   : > { %v774_v27 = vpack.c.bf16 %v769_v24, %v769_v24  ;;  %v2649_v28 = vpop.f32.mrb[7].mxu1 }
 0x145   : > { %775 = vxpose.xlu0.c.b16.start.end [1/1] (short) (narrow) %v774_v27, 64 }
 0x19b   : > { %v659_v29 = vpop.trf.xlu0 }
 0x19c   : > { %v2460_v30 = vcombine.low %v659_v29, %v659_v29  ;;  %v2461_v32 = vcombine.high %v659_v29, %v659_v29 }
 0x19e   : > { %927 = vxpose.xlu1.c.b16.start.end [1/1] (short) (narrow) %v2460_v30, 16 }
 0x19f   : > { %v660_v31 = vpop.trf.xlu0 }
 0x1a0   : > { %v2462_v33 = vcombine.low %v660_v31, %v660_v31  ;;  %v2463_v37 = vcombine.high %v660_v31, %v660_v31 }
 0x1a2   : > { %943 = vxpose.xlu1.c.b16.start.end [1/1] (short) (narrow) %v2461_v32, 16 }
 0x1a3   : > { %v661_v34 = vpop.trf.xlu0 }
 0x1a4   : > { %v2465_v35 = vcombine.high %v661_v34, %v661_v34  ;;  %v2464_v38 = vcombine.low %v661_v34, %v661_v34 }
 0x1a6   : > { %959 = vxpose.xlu1.c.b16.start.end [1/1] (short) (narrow) %v2462_v33, 16  ;;  %1007 = vxpose.xlu0.c.b16.start.end [1/1] (short) (narrow) %v2465_v35, 16 }
 0x1a7   : > { %v662_v36 = vpop.trf.xlu0 }
 0x1a8   : > { %v2466_v42 = vcombine.low %v662_v36, %v662_v36  ;;  %v2467_v48 = vcombine.high %v662_v36, %v662_v36 }
 0x1aa   : > { %975 = vxpose.xlu1.c.b16.start.end [1/1] (short) (narrow) %v2463_v37, 16 }
 0x1ab   : > { %v783_v39 = vpop.trf.xlu0 }
 0x1ac   : > { %v2474_v40 = vcombine.low %v783_v39, %v783_v39  ;;  %v2475_v41 = vcombine.high %v783_v39, %v783_v39 }
 0x1ae   : > { %991 = vxpose.xlu1.c.b16.start.end [1/1] (short) (narrow) %v2464_v38, 16  ;;  %v1061_v43 = vsel %vm1059_vm2, %v2474_v40, 0  ;;  %v1107_v44 = vsel %vm1059_vm2, %v2475_v41, 0 }
 0x1af   : > { %2663 = vmatpush3.bf16.msra.mxu1 %v1061_v43  ;;  %v784_v45 = vpop.trf.xlu0 }
 0x1b0   : > { %v2476_v46 = vcombine.low %v784_v45, %v784_v45  ;;  %v2477_v47 = vcombine.high %v784_v45, %v784_v45  ;;  %2668 = vmatprep.subr.bf16.mxu1 %v2998_v0 }
 0x1b2   : > { %1023 = vxpose.xlu1.c.b16.start.end [1/1] (short) (narrow) %v2466_v42, 16  ;;  %v1153_v49 = vsel %vm1059_vm2, %v2476_v46, 0  ;;  %v1199_v50 = vsel %vm1059_vm2, %v2477_v47, 0 }
 0x1b3   : > { %2675 = vmatpush3.bf16.msra.mxu0 %v1153_v49  ;;  %v785_v52 = vpop.trf.xlu0 }
 0x1b4   : > { %2686 = vmatprep.subr.bf16.mxu0 %v2998_v0  ;;  %v2478_v53 = vcombine.low %v785_v52, %v785_v52  ;;  %v2479_v60 = vcombine.high %v785_v52, %v785_v52 }
 0x1b6   : > { %1039 = vxpose.xlu1.c.b16.start.end [1/1] (short) (narrow) %v2467_v48, 16  ;;  %v1245_v55 = vsel %vm1059_vm2, %v2478_v53, 0  ;;  %v1291_v63 = vsel %vm1059_vm2, %v2479_v60, 0 }
 0x1b7   : > { %v786_v57 = vpop.trf.xlu0 }
 0x1b8   : > { %v2480_v58 = vcombine.low %v786_v57, %v786_v57  ;;  %v2481_v1 = vcombine.high %v786_v57, %v786_v57 }
 0x1ba   : > { %v1337_v61 = vsel %vm1059_vm2, %v2480_v58, 0  ;;  %v1383_v8 = vsel %vm1059_vm2, %v2481_v1, 0 }
 0x204   : > { %v935_v51 = vpop.trf.xlu1 }
 0x205   : > { %2665 = vmatmul.mubr.msk.bf16.vlgmr.msra.gmra.mrb[8].mxu1 %vm1055_vm3, %v935_v51 }
 0x206   : > { %2669 = vmatpush3.bf16.msra.mxu1 %v1107_v44  ;;  %2670 = vmatprep.mubr.msk.bf16.mxu1 %vm2999_vm0, %v2998_v0 }
 0x207   : > { %2680 = vmatprep.subr.bf16.mxu1 %v2998_v0 }
 0x208   : > { %v951_v54 = vpop.trf.xlu1 }
 0x20c   : > { %v967_v56 = vpop.trf.xlu1  ;;  %v1015_v2 = vpop.trf.xlu0 }
 0x20d   : > { %2671 = vmatmul.mubr.msk.bf16.vlgmr.msra.gmra.mrb[12].mxu1 %vm1055_vm3, %v951_v54  ;;  %2677 = vmatmul.mubr.msk.bf16.vlgmr.msra.gmra.mrb[4].mxu0 %vm1055_vm3, %v967_v56 }
 0x20e   : > { %2681 = vmatpush3.bf16.msra.mxu1 %v1199_v50  ;;  %2687 = vmatpush3.bf16.msra.mxu0 %v1245_v55 }
 0x20f   : > { %2682 = vmatprep.mubr.msk.bf16.mxu1 %vm2999_vm0, %v2998_v0  ;;  %2688 = vmatprep.mubr.msk.bf16.mxu0 %vm2999_vm0, %v2998_v0 }
 0x210   : > { %v983_v59 = vpop.trf.xlu1  ;;  %2692 = vmatprep.subr.bf16.mxu1 %v2998_v0  ;;  %2698 = vmatprep.subr.bf16.mxu0 %v2998_v0 }
 0x214   : > { %v999_v62 = vpop.trf.xlu1 }
 0x215   : > { %2683 = vmatmul.mubr.msk.bf16.vlgmr.msra.gmra.mrb[16].mxu1 %vm1055_vm3, %v983_v59  ;;  %2689 = vmatmul.mubr.msk.bf16.vlgmr.msra.gmra.mrb[8].mxu0 %vm1055_vm3, %v999_v62 }
 0x216   : > { %2693 = vmatpush3.bf16.msra.mxu1 %v1291_v63  ;;  %2699 = vmatpush3.bf16.msra.mxu0 %v1337_v61 }
 0x217   : > { %2694 = vmatprep.mubr.msk.bf16.mxu1 %vm2999_vm0, %v2998_v0  ;;  %2700 = vmatprep.mubr.msk.bf16.mxu0 %vm2999_vm0, %v2998_v0 }
 0x218   : > { %2704 = vmatprep.subr.bf16.mxu1 %v2998_v0  ;;  %2710 = vmatprep.subr.bf16.mxu0 %v2998_v0  ;;  %v1031_v3 = vpop.trf.xlu1 }
 0x21c   : > { %v1047_v10 = vpop.trf.xlu1 }
 0x21d   : > { %2695 = vmatmul.mubr.msk.bf16.vlgmr.msra.gmra.mrb[20].mxu1 %vm1055_vm3, %v1015_v2  ;;  %2701 = vmatmul.mubr.msk.bf16.vlgmr.msra.gmra.mrb[12].mxu0 %vm1055_vm3, %v1031_v3 }
 0x21e   : > { %2705 = vmatpush3.bf16.msra.mxu1 %v1383_v8  ;;  %2706 = vmatprep.mubr.msk.bf16.mxu1 %vm2999_vm0, %v2998_v0 }
 0x21f   : > { %2716 = vmatprep.subr.bf16.mxu1 %v2998_v0  ;;  %2712 = vmatprep.mubr.msk.bf16.mxu0 %vm2999_vm0, %v2998_v0 }
 0x225   : > { %2707 = vmatmul.mubr.msk.bf16.vlgmr.msra.gmra.mrb[24].mxu1 %vm1055_vm3, %v1047_v10 }
 0x226   : > { %2718 = vmatprep.mubr.msk.bf16.mxu1 %vm2999_vm0, %v2998_v0 }
 0x2d8   : > { %v1097_v11 = vpop.f32.mrb[8].mxu1 }
 0x2d9   : > { %v2666_v12 = vpop.f32.mrb[9].mxu1  ;;  %v1425_v13 = vsel %vm1055_vm3, %v1097_v11, -inf }
 0x2da   : > { %1426 = vmax.xlane.f32.xlu1 %v1425_v13  ;;  %v1100_v14 = vpop.f32.mrb[10].mxu1 }
 0x2db   : > { %v2667_v15 = vpop.f32.mrb[11].mxu1 }
 0x2e0   : > { %v1143_v16 = vpop.f32.mrb[12].mxu1  ;;  %v1189_v17 = vpop.f32.mrb[4].mxu0 }
 0x2e1   : > { %v2672_v18 = vpop.f32.mrb[13].mxu1  ;;  %v2678_v19 = vpop.f32.mrb[5].mxu0  ;;  %v1431_v20 = vsel %vm1055_vm3, %v1189_v17, -inf  ;;  %v1428_v21 = vsel %vm1055_vm3, %v1143_v16, -inf }
 0x2e2   : > { %v1192_v22 = vpop.f32.mrb[6].mxu0  ;;  %1432 = vmax.xlane.f32.xlu1 %v1431_v20  ;;  %1429 = vmax.xlane.f32.xlu0 %v1428_v21  ;;  %v1146_v23 = vpop.f32.mrb[14].mxu1 }
 0x2e3   : > { %v2673_v24 = vpop.f32.mrb[15].mxu1  ;;  %v2679_v25 = vpop.f32.mrb[7].mxu0 }
 0x2e8   : > { %v1235_v26 = vpop.f32.mrb[16].mxu1  ;;  %v1281_v27 = vpop.f32.mrb[8].mxu0 }
 0x2e9   : > { %v2684_v28 = vpop.f32.mrb[17].mxu1  ;;  %v2690_v29 = vpop.f32.mrb[9].mxu0  ;;  %v1437_v30 = vsel %vm1055_vm3, %v1281_v27, -inf  ;;  %v1434_v31 = vsel %vm1055_vm3, %v1235_v26, -inf }
 0x2ea   : > { %v1284_v32 = vpop.f32.mrb[10].mxu0  ;;  %1438 = vmax.xlane.f32.xlu1 %v1437_v30  ;;  %1435 = vmax.xlane.f32.xlu0 %v1434_v31  ;;  %v1238_v33 = vpop.f32.mrb[18].mxu1  ;;  %v2482_v30 = vld [vmem:[%s3567_s6] ss:$0 sm:$0xff] }
 0x2eb   : > { %v2685_v34 = vpop.f32.mrb[19].mxu1  ;;  %v2691_v35 = vpop.f32.mrb[11].mxu0  ;;  %v885_v31 = vadd.f32 %v2482_v30, %v3309_v4 }
 0x2ed   : > { %v890_v32 = vpack.c.bf16 %v885_v31, %v885_v31 }
 0x2f0   : > { %v1327_v36 = vpop.f32.mrb[20].mxu1  ;;  %v1373_v37 = vpop.f32.mrb[12].mxu0 }
 0x2f1   : > { %v2702_v38 = vpop.f32.mrb[13].mxu0  ;;  %v1443_v39 = vsel %vm1055_vm3, %v1373_v37, -inf  ;;  %v1440_v40 = vsel %vm1055_vm3, %v1327_v36, -inf  ;;  %v2696_v41 = vpop.f32.mrb[21].mxu1 }
 0x2f2   : > { %v1376_v42 = vpop.f32.mrb[14].mxu0  ;;  %1444 = vmax.xlane.f32.xlu1 %v1443_v39  ;;  %1441 = vmax.xlane.f32.xlu0 %v1440_v40  ;;  %v1330_v43 = vpop.f32.mrb[22].mxu1 }
 0x2f3   : > { %v2703_v44 = vpop.f32.mrb[15].mxu0  ;;  %v2697_v45 = vpop.f32.mrb[23].mxu1 }
 0x2f8   : > { %v1419_v46 = vpop.f32.mrb[24].mxu1 }
 0x2f9   : > { %v1446_v47 = vsel %vm1055_vm3, %v1419_v46, -inf  ;;  %v2708_v48 = vpop.f32.mrb[25].mxu1 }
 0x2fa   : > { %1447 = vmax.xlane.f32.xlu0 %v1446_v47  ;;  %v1422_v49 = vpop.f32.mrb[26].mxu1 }
 0x2fb   : > { %v2709_v50 = vpop.f32.mrb[27].mxu1 }
 0x367   : > { %v1427_v51 = vpop.xlane.xlu1 %1426 }
 0x368   : > { %v1449_v52 = vsub.f32 %v1097_v11, %v1427_v51 }
 0x36a   : > { %v1457_v53 = vmul.f32 1.442695, %v1449_v52 }
 0x36c   : > { %2863 = vpow2.f32 %v1457_v53 }
 0x36f   : > { %v1433_v54 = vpop.xlane.xlu1 %1432  ;;  %v1430_v55 = vpop.xlane.xlu0 %1429 }
 0x370   : > { %v1451_v56 = vsub.f32 %v1189_v17, %v1433_v54  ;;  %v1450_v57 = vsub.f32 %v1143_v16, %v1430_v55 }
 0x372   : > { %v1461_v58 = vmul.f32 1.442695, %v1451_v56  ;;  %v1459_v59 = vmul.f32 1.442695, %v1450_v57 }
 0x374   : > { %2865 = vpow2.f32 %v1461_v58 }
 0x375   : > { %2867 = vpow2.f32 %v1459_v59 }
 0x376   : > { %v2864_v60 = vpop.eup %2863 }
 0x377   : > { %v1439_v61 = vpop.xlane.xlu1 %1438  ;;  %v1436_v62 = vpop.xlane.xlu0 %1435  ;;  %v1473_v63 = vsel %vm1055_vm3, %v2864_v60, 0.0 }
 0x378   : > { %v1453_v1 = vsub.f32 %v1281_v27, %v1439_v61  ;;  %v1452_v2 = vsub.f32 %v1235_v26, %v1436_v62  ;;  %1474 = vadd.xlane.f32.xlu1 %v1473_v63 }
 0x37a   : > { %v1465_v3 = vmul.f32 1.442695, %v1453_v1  ;;  %v1463_v6 = vmul.f32 1.442695, %v1452_v2 }
 0x37c   : > { %2869 = vpow2.f32 %v1465_v3 }
 0x37d   : > { %2871 = vpow2.f32 %v1463_v6 }
 0x37e   : > { %v2866_v7 = vpop.eup %2865 }
 0x37f   : > { %v2868_v8 = vpop.eup %2867  ;;  %v1445_v9 = vpop.xlane.xlu1 %1444  ;;  %v1479_v11 = vsel %vm1055_vm3, %v2866_v7, 0.0 }
 0x380   : > { %v1442_v10 = vpop.xlane.xlu0 %1441  ;;  %v1455_v12 = vsub.f32 %v1373_v37, %v1445_v9  ;;  %1480 = vadd.xlane.f32.xlu1 %v1479_v11  ;;  %v1476_v14 = vsel %vm1055_vm3, %v2868_v8, 0.0 }
 0x381   : > { %v1454_v13 = vsub.f32 %v1327_v36, %v1442_v10  ;;  %1477 = vadd.xlane.f32.xlu0 %v1476_v14 }
 0x382   : > { %v1469_v15 = vmul.f32 1.442695, %v1455_v12 }
 0x383   : > { %v1467_v16 = vmul.f32 1.442695, %v1454_v13 }
 0x384   : > { %2873 = vpow2.f32 %v1469_v15 }
 0x385   : > { %2875 = vpow2.f32 %v1467_v16 }
 0x386   : > { %v3333_v17 = vpop.eup %2869 }
 0x387   : > { %v2872_v18 = vpop.eup %2871  ;;  %v1448_v19 = vpop.xlane.xlu0 %1447  ;;  %v1485_v20 = vsel %vm1055_vm3, %v3333_v17, 0.0 }
 0x388   : > { %v1456_v21 = vsub.f32 %v1419_v46, %v1448_v19  ;;  %1486 = vadd.xlane.f32.xlu1 %v1485_v20  ;;  %v1482_v22 = vsel %vm1055_vm3, %v2872_v18, 0.0 }
 0x389   : > { %1483 = vadd.xlane.f32.xlu0 %v1482_v22 }
 0x38a   : > { %v1471_v23 = vmul.f32 1.442695, %v1456_v21 }
 0x38c   : > { %2877 = vpow2.f32 %v1471_v23  ;;  %v2831_v23 = vld [vmem:[%s3568_s7] sm:$0xff]  }
 0x38e   : > { %v3338_v24 = vpop.eup %2873 }
 0x38f   : > { %v3340_v25 = vpop.eup %2875  ;;  %v1491_v26 = vsel %vm1055_vm3, %v3338_v24, 0.0 }
 0x390   : > { %1492 = vadd.xlane.f32.xlu1 %v1491_v26  ;;  %v1488_v27 = vsel %vm1055_vm3, %v3340_v25, 0.0  ;;  %v2834_v26 = vld [vmem:[%s3568_s7 + $0x18] sm:$0xff]  }
 0x391   : > { %1489 = vadd.xlane.f32.xlu0 %v1488_v27 }
 0x396   : > { %v3346_v28 = vpop.eup %2877 }
 0x397   : > { %v1494_v29 = vsel %vm1055_vm3, %v3346_v28, 0.0 }
 0x398   : > { %1495 = vadd.xlane.f32.xlu0 %v1494_v29 }
 0x3bd   : > { %891 = vxpose.xlu1.c.b16.start.end [1/1] (short) (narrow) %v890_v32, 64 }
 0x405   : > { %v1475_v33 = vpop.xlane.xlu1 %1474 }
 0x406   : > { %2879 = vrcp.f32 %v1475_v33 }
 0x40d   : > { %v1481_v34 = vpop.xlane.xlu1 %1480 }
 0x40e   : > { %v1478_v35 = vpop.xlane.xlu0 %1477 }
 0x40f   : > { %2881 = vrcp.f32 %v1478_v35 }
 0x410   : > { %v2880_v36 = vpop.eup %2879  ;;  %2883 = vrcp.f32 %v1481_v34 }
 0x411   : > { %v1513_v37 = vmul.f32 %v2880_v36, %v2864_v60 }
 0x413   : > { %v1521_v38 = vpack.c.bf16 %v1513_v37, %v1513_v37 }
 0x415   : > { %v1533_v39 = vsel %vm1055_vm3, %v1521_v38, 0  ;;  %v1487_v40 = vpop.xlane.xlu1 %1486 }
 0x416   : > { %v1484_v41 = vpop.xlane.xlu0 %1483  ;;  %2711 = vmatpush3.bf16.xpose.msra.mxu0 %v1533_v39 }
 0x417   : > { %2885 = vrcp.f32 %v1484_v41  ;;  %2722 = vmatprep.subr.bf16.mxu0 %v2998_v0 }
 0x418   : > { %2887 = vrcp.f32 %v1487_v40 }
 0x419   : > { %v2882_v4 = vpop.eup %2881 }
 0x41a   : > { %v1514_v42 = vmul.f32 %v2882_v4, %v2868_v8  ;;  %v2884_v43 = vpop.eup %2883 }
 0x41b   : > { %v1515_v48 = vmul.f32 %v2884_v43, %v2866_v7 }
 0x41c   : > { %v1522_v44 = vpack.c.bf16 %v1514_v42, %v1514_v42 }
 0x41d   : > { %v1493_v45 = vpop.xlane.xlu1 %1492  ;;  %v1523_v50 = vpack.c.bf16 %v1515_v48, %v1515_v48 }
 0x41e   : > { %v1490_v46 = vpop.xlane.xlu0 %1489  ;;  %v1579_v47 = vsel %vm1055_vm3, %v1522_v44, 0 }
 0x41f   : > { %2889 = vrcp.f32 %v1490_v46  ;;  %2717 = vmatpush3.bf16.xpose.msra.mxu1 %v1579_v47  ;;  %v1625_v58 = vsel %vm1055_vm3, %v1523_v50, 0 }
 0x420   : > { %2728 = vmatprep.subr.bf16.mxu1 %v2998_v0  ;;  %2891 = vrcp.f32 %v1493_v45 }
 0x421   : > { %v2886_v49 = vpop.eup %2885 }
 0x422   : > { %v1516_v51 = vmul.f32 %v2886_v49, %v2872_v18  ;;  %v2888_v52 = vpop.eup %2887 }
 0x423   : > { %v899_v53 = vpop.trf.xlu1  ;;  %v1517_v60 = vmul.f32 %v2888_v52, %v3333_v17 }
 0x424   : > { %v2488_v54 = vcombine.low %v899_v53, %v899_v53  ;;  %v2489_v55 = vcombine.high %v899_v53, %v899_v53  ;;  %v1524_v56 = vpack.c.bf16 %v1516_v51, %v1516_v51 }
 0x425   : > { %v1496_v57 = vpop.xlane.xlu0 %1495  ;;  %v1525_v2 = vpack.c.bf16 %v1517_v60, %v1517_v60 }
 0x426   : > { %2893 = vrcp.f32 %v1496_v57  ;;  %2713 = vmatmul.mubr.msk.bf16.vlgmr.msra.gmra.mrb[16].mxu0 %vm1055_vm3, %v2488_v54  ;;  %2719 = vmatmul.mubr.msk.bf16.vlgmr.msra.gmra.mrb[28].mxu1 %vm1055_vm3, %v2489_v55  ;;  %v1671_v59 = vsel %vm1055_vm3, %v1524_v56, 0 }
 0x427   : > { %2723 = vmatpush3.bf16.xpose.msra.mxu0 %v1625_v58  ;;  %2729 = vmatpush3.bf16.xpose.msra.mxu1 %v1671_v59  ;;  %v900_v61 = vpop.trf.xlu1  ;;  %v1717_v8 = vsel %vm1055_vm3, %v1525_v2, 0  ;;  %v2512_v59 = vld [vmem:[%s3569_s8] ss:$0 sm:$0xff] }
 0x428   : > { %2724 = vmatprep.mubr.msk.bf16.mxu0 %vm2999_vm0, %v2998_v0  ;;  %2730 = vmatprep.mubr.msk.bf16.mxu1 %vm2999_vm0, %v2998_v0  ;;  %v2490_v63 = vcombine.low %v900_v61, %v900_v61  ;;  %v2491_v1 = vcombine.high %v900_v61, %v900_v61 }
 0x429   : > { %v2890_v62 = vpop.eup %2889  ;;  %2734 = vmatprep.subr.bf16.mxu0 %v2998_v0  ;;  %2740 = vmatprep.subr.bf16.mxu1 %v2998_v0 }
 0x42a   : > { %v1518_v3 = vmul.f32 %v2890_v62, %v3340_v25  ;;  %v2892_v6 = vpop.eup %2891  ;;  %v2833_v25 = vld [vmem:[%s3568_s7 + $0x10] sm:$0xff]  }
 0x42b   : > { %v1519_v10 = vmul.f32 %v2892_v6, %v3338_v24  ;;  %v901_v11 = vpop.trf.xlu1  ;;  %v2832_v24 = vld [vmem:[%s3568_s7 + $0x8] sm:$0xff]  }
 0x42c   : > { %v1526_v7 = vpack.c.bf16 %v1518_v3, %v1518_v3  ;;  %v2492_v14 = vcombine.low %v901_v11, %v901_v11  ;;  %v2493_v15 = vcombine.high %v901_v11, %v901_v11  ;;  %v2837_v11 = vld [vmem:[%s3572_s11 + $0x4] ss:$8 sps:$4 sm:$0xff]  }
 0x42d   : > { %v1527_v16 = vpack.c.bf16 %v1519_v10, %v1519_v10 }
 0x42e   : > { %2725 = vmatmul.mubr.msk.bf16.vlgmr.msra.gmra.mrb[20].mxu0 %vm1055_vm3, %v2490_v63  ;;  %2731 = vmatmul.mubr.msk.bf16.vlgmr.msra.gmra.mrb[32].mxu1 %vm1055_vm3, %v2491_v1  ;;  %v1763_v9 = vsel %vm1055_vm3, %v1526_v7, 0 }
 0x42f   : > { %2735 = vmatpush3.bf16.xpose.msra.mxu0 %v1717_v8  ;;  %2741 = vmatpush3.bf16.xpose.msra.mxu1 %v1763_v9  ;;  %v1809_v19 = vsel %vm1055_vm3, %v1527_v16, 0  ;;  %v902_v20 = vpop.trf.xlu1  ;;  %v2844_v16 = vld [vmem:[%s3572_s11 + $0x30] ss:$8 sps:$4 sm:$0xff]  }
 0x430   : > { %v2894_v12 = vpop.eup %2893  ;;  %2736 = vmatprep.mubr.msk.bf16.mxu0 %vm2999_vm0, %v2998_v0  ;;  %2742 = vmatprep.mubr.msk.bf16.mxu1 %vm2999_vm0, %v2998_v0  ;;  %v2494_v21 = vcombine.low %v902_v20, %v902_v20  ;;  %v2495_v22 = vcombine.high %v902_v20, %v902_v20  ;;  %v2848_v20 = vld [vmem:[%s3574_s13] sm:$0xff]  }
 0x431   : > { %2746 = vmatprep.subr.bf16.mxu0 %v2998_v0  ;;  %2752 = vmatprep.subr.bf16.mxu1 %v2998_v0  ;;  %v1520_v13 = vmul.f32 %v2894_v12, %v3346_v28  ;;  %v2835_v12 = vld [vmem:[%s3572_s11] ss:$8 sps:$4 sm:$0xff]  }
 0x433   : > { %v1528_v17 = vpack.c.bf16 %v1520_v13, %v1520_v13  ;;  %v2838_v13 = vld [vmem:[%s3572_s11 + $0x10] ss:$8 sps:$4 sm:$0xff]  }
 0x435   : > { %v1855_v18 = vsel %vm1055_vm3, %v1528_v17, 0  ;;  %v2846_v17 = vld [vmem:[%s3572_s11 + $0x34] ss:$8 sps:$4 sm:$0xff]  }
 0x436   : > { %2737 = vmatmul.mubr.msk.bf16.vlgmr.msra.gmra.mrb[24].mxu0 %vm1055_vm3, %v2492_v14  ;;  %2743 = vmatmul.mubr.msk.bf16.vlgmr.msra.gmra.mrb[36].mxu1 %vm1055_vm3, %v2493_v15  ;;  %v2843_v14 = vld [vmem:[%s3572_s11 + $0x24] ss:$8 sps:$4 sm:$0xff]   ;;  %v2841_v15 = vld [vmem:[%s3572_s11 + $0x20] ss:$8 sps:$4 sm:$0xff]  }
 0x437   : > { %2747 = vmatpush3.bf16.xpose.msra.mxu0 %v1809_v19  ;;  %2753 = vmatpush3.bf16.xpose.msra.mxu1 %v1855_v18  ;;  %v3000_v18 = vmov 0   ;;  %v2847_v19 = vld [vmem:[%s3574_s13 + $0x40] sm:$0xff]  }
 0x438   : > { %2748 = vmatprep.mubr.msk.bf16.mxu0 %vm2999_vm0, %v2998_v0  ;;  %2754 = vmatprep.mubr.msk.bf16.mxu1 %vm2999_vm0, %v2998_v0 }
 0x439   : > { %2758 = vmatprep.subr.bf16.mxu0 %v2998_v0  ;;  %2107 = vmatprep.subr.bf16.mxu1 %v2837_v11 }
 0x43e   : > { %2749 = vmatmul.mubr.msk.bf16.vlgmr.msra.gmra.mrb[28].mxu0 %vm1055_vm3, %v2494_v21  ;;  %2755 = vmatmul.mubr.msk.bf16.vlgmr.msra.gmra.mrb[40].mxu1 %vm1055_vm3, %v2495_v22  ;;  %v2849_v21 = vld [vmem:[%s3574_s13 + $0x48] sm:$0xff]  }
 0x43f   : > { %2766 = vmatprep.mubr.msk.bf16.mxu0 %vm2999_vm0, %v2998_v0  ;;  %2759 = vmatpush3.bf16.msra.mxu0 %v2831_v23  ;;  %v2850_v22 = vld [vmem:[%s3574_s13 + $0x8] sm:$0xff]   ;;  %v2851_v23 = vld [vmem:[%s3574_s13 + $0x50] sm:$0xff]  }
 0x440   : > { %2760 = vmatprep.subr.bf16.mxu0 %v2998_v0  ;;  %2108 = vmatpush1.bf16.msra.mxu1 %v2835_v12 }
 0x441   : > { %2139 = vmatprep.mubr.bf16.mxu1 %v3000_v18  ;;  %v2546_v18 = vld [vmem:[%s3618_s21] ss:$0 sm:$0xff]  ;;  %s2933_s21 = sshll.u32 %s3001_s28, 4  ;;  %s2934_s21 = int_to_ptr.vmem [resolvable:$false] %s2933_s21 }
 0x442   : > { %s2935_s19 = scalar_lea.vmem %s2934_s21, 256  ;;  %p2936_p7 = scmp.lt.s32.totalorder %s3518_s0, %s2934_s21 }
 0x443   : > { %2761 = vmatpush3.bf16.msra.mxu0 %v2832_v24  ;;  %v2852_v24 = vld [vmem:[%s3574_s13 + $0x10] sm:$0xff]   ;;  %p2937_p10 = scmp.lt.s32.totalorder %s2935_s19, %s2929_s20 }
 0x444   : > { %2762 = vmatprep.subr.bf16.mxu0 %v2998_v0 }
 0x445   : > { %p2938_p2 = por %p2937_p10, %p2936_p7 }
 0x447   : > { %2763 = vmatpush3.bf16.msra.mxu0 %v2833_v25  ;;  %v2853_v25 = vld [vmem:[%s3574_s13 + $0x58] sm:$0xff]   ;;  %p2939_p4 = pnand %p2938_p2, %p2932_p13 }
 0x448   : > { %2764 = vmatprep.subr.bf16.mxu0 %v2998_v0 }
 0x44b   : > { %2765 = vmatpush3.bf16.msra.mxu0 %v2834_v26  ;;  %v2854_v26 = vld [vmem:[%s3574_s13 + $0x18] sm:$0xff]  }
 0x44c   : > { %2604 = vmatprep.subr.bf16.mxu0 %v2847_v19 }
 0x4f9   : > { %v1569_v27 = vpop.f32.mrb[16].mxu0  ;;  %v1615_v28 = vpop.f32.mrb[28].mxu1 }
 0x4fa   : > { %v2714_v29 = vpop.f32.mrb[17].mxu0  ;;  %1897 = vxpose.xlu0.b32.start [1/8] (short) (narrow) %v1569_v27, 8  ;;  %v2720_v30 = vpop.f32.mrb[29].mxu1  ;;  %v2855_v27 = vld [vmem:[%s3574_s13 + $0x60] sm:$0xff]  }
 0x4fb   : > { %v1572_v31 = vpop.f32.mrb[18].mxu0  ;;  %v1618_v32 = vpop.f32.mrb[30].mxu1  ;;  %v2857_v29 = vld [vmem:[%s3574_s13 + $0x68] sm:$0xff]  }
 0x4fc   : > { %v2715_v33 = vpop.f32.mrb[19].mxu0  ;;  %v2721_v34 = vpop.f32.mrb[31].mxu1  ;;  %v2858_v30 = vld [vmem:[%s3574_s13 + $0x28] sm:$0xff]  }
 0x4fe   : > { %1898 = vxpose.xlu0.b32.cont [2/8] (short) (narrow) %v1615_v28, 8  ;;  %v2856_v28 = vld [vmem:[%s3574_s13 + $0x20] sm:$0xff]  }
 0x501   : > { %v1661_v35 = vpop.f32.mrb[20].mxu0  ;;  %v1707_v36 = vpop.f32.mrb[32].mxu1 }
 0x502   : > { %v2726_v37 = vpop.f32.mrb[21].mxu0  ;;  %1899 = vxpose.xlu0.b32.cont [3/8] (short) (narrow) %v1661_v35, 8  ;;  %v2732_v38 = vpop.f32.mrb[33].mxu1  ;;  %v2518_v35 = vld [vmem:[%s3570_s9] ss:$0 sm:$0xff] }
 0x503   : > { %v1664_v39 = vpop.f32.mrb[22].mxu0  ;;  %v1710_v40 = vpop.f32.mrb[34].mxu1  ;;  %v2519_v37 = vld [vmem:[%s3571_s10] ss:$0 sm:$0xff] }
 0x504   : > { %v2727_v41 = vpop.f32.mrb[23].mxu0  ;;  %v2733_v0 = vpop.f32.mrb[35].mxu1 }
 0x505   : > { %v2859_v41 = vld [vmem:[%s3574_s13 + $0x70] sm:$0xff]  }
 0x506   : > { %1900 = vxpose.xlu0.b32.cont [4/8] (short) (narrow) %v1707_v36, 8  ;;  %v2860_v0 = vld [vmem:[%s3574_s13 + $0x30] sm:$0xff]  }
 0x509   : > { %v1753_v4 = vpop.f32.mrb[24].mxu0  ;;  %v1799_v42 = vpop.f32.mrb[36].mxu1 }
 0x50a   : > { %v2738_v43 = vpop.f32.mrb[25].mxu0  ;;  %1901 = vxpose.xlu0.b32.cont [5/8] (short) (narrow) %v1753_v4, 8  ;;  %v2744_v44 = vpop.f32.mrb[37].mxu1  ;;  %v2861_v4 = vld [vmem:[%s3574_s13 + $0x78] sm:$0xff]  }
 0x50b   : > { %v1756_v45 = vpop.f32.mrb[26].mxu0  ;;  %v1802_v46 = vpop.f32.mrb[38].mxu1  ;;  %v2054_v43 = vlaneseq }
 0x50c   : > { %v2739_v47 = vpop.f32.mrb[27].mxu0  ;;  %v2745_v48 = vpop.f32.mrb[39].mxu1  ;;  %v2052_v46 = vld [vmem:[%s3573_s12] sm:$0x3] }
 0x50d   : > { %v2055_v44 = vshrl.u32 %v2054_v43, 7 }
 0x50e   : > { %1902 = vxpose.xlu0.b32.cont [6/8] (short) (narrow) %v1799_v42, 8  ;;  %v2862_v42 = vld [vmem:[%s3574_s13 + $0x38] sm:$0xff]  }
 0x50f   : > { %v2056_v45 = vsub.s32 0, %v2055_v44  ;;  %v2060_v47 = vsub.s32 1, %v2055_v44 }
 0x511   : > { %v1845_v49 = vpop.f32.mrb[28].mxu0  ;;  %v1891_v50 = vpop.f32.mrb[40].mxu1  ;;  %v2057_v48 = vrot.slane %v2052_v46, %v2056_v45 }
 0x512   : > { %v2750_v51 = vpop.f32.mrb[29].mxu0  ;;  %1903 = vxpose.xlu0.b32.cont [7/8] (short) (narrow) %v1845_v49, 8  ;;  %v2756_v52 = vpop.f32.mrb[41].mxu1  ;;  %v2061_v49 = vrot.slane %v2052_v46, %v2060_v47 }
 0x513   : > { %v1848_v53 = vpop.f32.mrb[30].mxu0  ;;  %v1894_v54 = vpop.f32.mrb[42].mxu1 }
 0x514   : > { %v2751_v55 = vpop.f32.mrb[31].mxu0  ;;  %v2757_v56 = vpop.f32.mrb[43].mxu1 }
 0x516   : > { %1904 = vxpose.xlu0.b32.end [8/8] (short) (narrow) %v1891_v50, 8 }
 0x57a   : > { %v1913_v57 = vpop.trf.xlu0 }
 0x57b   : > { %v1929_v58 = vpack.c.bf16 %v1913_v57, %v1913_v57 }
 0x57d   : > { %2767 = vmatmul.mubr.msk.bf16.vlgmr.msra.gmra.mrb[32].mxu0 %vm606_vm1, %v1929_v58 }
 0x57e   : > { %2605 = vmatpush3.bf16.msra.mxu0 %v2848_v20  ;;  %v2547_v20 = vld [vmem:[%s3619_s18] ss:$0 sm:$0xff] }
 0x57f   : > { %2606 = vmatprep.subr.bf16.mxu0 %v2849_v21 }
 0x582   : > { %2607 = vmatpush3.bf16.msra.mxu0 %v2850_v22 }
 0x583   : > { %2608 = vmatprep.subr.bf16.mxu0 %v2851_v23 }
 0x586   : > { %2609 = vmatpush3.bf16.msra.mxu0 %v2852_v24 }
 0x587   : > { %2610 = vmatprep.subr.bf16.mxu0 %v2853_v25 }
 0x58a   : > { %2611 = vmatpush3.bf16.msra.mxu0 %v2854_v26 }
 0x58b   : > { %2612 = vmatprep.subr.bf16.mxu0 %v2855_v27 }
 0x58e   : > { %2613 = vmatpush3.bf16.msra.mxu0 %v2856_v28 }
 0x58f   : > { %2614 = vmatprep.subr.bf16.mxu0 %v2857_v29 }
 0x592   : > { %2615 = vmatpush3.bf16.msra.mxu0 %v2858_v30 }
 0x593   : > { %2616 = vmatprep.subr.bf16.mxu0 %v2859_v41 }
 0x596   : > { %2617 = vmatpush3.bf16.msra.mxu0 %v2860_v0 }
 0x597   : > { %2618 = vmatprep.subr.bf16.mxu0 %v2861_v4 }
 0x59a   : > { %2619 = vmatpush3.bf16.msra.mxu0 %v2862_v42 }
 0x650   : > { %v2006_v60 = vpop.f32.mrb[32].mxu0 }
 0x651   : > { %v2007_v61 = vadd.f32 %v2512_v59, %v2006_v60  ;;  %v2768_v62 = vpop.f32.mrb[33].mxu0 }
 0x652   : > { %v2009_v63 = vpop.f32.mrb[34].mxu0 }
 0x653   : > { %v2769_v1 = vpop.f32.mrb[35].mxu0  ;;  %v2012_v2 = vadd.f32 %v2007_v61, %v3227_v5  ;;  %v2840_v5 = vld [vmem:[%s3572_s11 + $0x14] ss:$8 sps:$4 sm:$0xff]   ;;  %v2529_v63 = vld [vmem:[%s3575_s14] ss:$0 sm:$0xff] }
 0x654   : > { %2109 = vmatprep.subr.bf16.mxu1 %v2840_v5 }
 0x655   : > { %v2015_v3 = vsel %vm606_vm1, %v2012_v2, 0.0  ;;  %2110 = vmatpush1.bf16.msra.mxu1 %v2838_v13 }
 0x656   : > { %2016 = vadd.xlane.f32.xlu1 %v2015_v3  ;;  %2111 = vmatprep.subr.bf16.mxu1 %v2843_v14 }
 0x659   : > { %2112 = vmatpush1.bf16.msra.mxu1 %v2841_v15 }
 0x65a   : > { %2113 = vmatprep.subr.bf16.mxu1 %v2846_v17 }
 0x65d   : > { %2114 = vmatpush1.bf16.msra.mxu1 %v2844_v16 }
 0x6e3   : > { %v2017_v6 = vpop.xlane.xlu1 %2016 }
 0x6e4   : > { %v2019_v7 = vmul.f32 0.015625, %v2017_v6 }
 0x6e6   : > { %v2020_v8 = vsub.f32 %v2012_v2, %v2019_v7 }
 0x6e8   : > { %v2021_v9 = vmul.f32 %v2020_v8, %v2020_v8 }
 0x6ea   : > { %v2022_v10 = vsel %vm606_vm1, %v2021_v9, 0.0 }
 0x6eb   : > { %2023 = vadd.xlane.f32.xlu1 %v2022_v10 }
 0x778   : > { %v2024_v31 = vpop.xlane.xlu1 %2023 }
 0x779   : > { %v2025_v32 = vmul.f32 0.015625, %v2024_v31 }
 0x77b   : > { %v2026_v33 = vadd.f32 1e-05, %v2025_v32 }
 0x77d   : > { %2895 = vrsqrt.f32 %v2026_v33 }
 0x787   : > { %v2896_v34 = vpop.eup %2895 }
 0x788   : > { %v2028_v36 = vmul.f32 %v2896_v34, %v2020_v8 }
 0x78a   : > { %v2035_v38 = vmul.f32 %v2518_v35, %v2028_v36 }
 0x78c   : > { %v2042_v39 = vadd.f32 %v2519_v37, %v2035_v38 }
 0x78e   : > { %v2043_v40 = vpack.c.bf16 %v2042_v39, %v2042_v39 }
 0x790   : > { %2528 = vmatmul.mubr.msk.bf16.vlgmr.msra.gmra.mrb[44].mxu1 %vm606_vm1, %v2043_v40 }
 0x863   : > { %v2141_v50 = vpop.f32.mrb[44].mxu1 }
 0x864   : > { %v2142_v51 = vadd.f32 %v2141_v50, %v2057_v48  ;;  %v2143_v52 = vpop.f32.mrb[45].mxu1 }
 0x865   : > { %v2144_v53 = vadd.f32 %v2143_v52, %v2061_v49  ;;  %v2145_v54 = vpop.f32.mrb[46].mxu1 }
 0x866   : > { %vm2148_vm4 = vcmp.gt.f32.partialorder %v2142_v51, 0.0  ;;  %v2150_v55 = vmul.f32 0.01, %v2142_v51  ;;  %v2146_v56 = vpop.f32.mrb[47].mxu1 }
 0x867   : > { %vm2149_vm5 = vcmp.gt.f32.partialorder %v2144_v53, 0.0  ;;  %v2151_v57 = vmul.f32 0.01, %v2144_v53 }
 0x868   : > { %v2152_v58 = vsel %vm2148_vm4, %v2142_v51, %v2150_v55 }
 0x869   : > { %v2153_v59 = vsel %vm2149_vm5, %v2144_v53, %v2151_v57  ;;  %v2154_v61 = vpack.c.bf16 %v2152_v58, %v2152_v58 }
 0x86a   : > { %v2155_v60 = vpack.c.bf16 %v2153_v59, %v2153_v59 }
 0x86c   : > { %2323 = vmatprep.mubr.bf16.mxu0 %v2155_v60 }
 0x86d   : > { %2324 = vmatmul.mubr.bf16.vlgmr.msra.gmra.mrb[36].mxu0 %v2154_v61 }
 0x940   : > { %v2620_v62 = vpop.f32.mrb[36].mxu0 }
 0x941   : > { %v2621_v1 = vpop.f32.mrb[37].mxu0 }
 0x942   : > { %v2622_v2 = vadd.f32 %v2621_v1, %v2620_v62  ;;  %v2623_v3 = vpop.f32.mrb[38].mxu0 }
 0x943   : > { %v2624_v6 = vpop.f32.mrb[39].mxu0 }
 0x944   : > { %v2326_v7 = vadd.f32 %v2622_v2, %v2529_v63 }
 0x946   : > { %v2331_v8 = vadd.f32 %v2326_v7, %v2042_v39 }
 0x948   : > { %v2334_v9 = vsel %vm606_vm1, %v2331_v8, 0.0 }
 0x949   : > { %2335 = vadd.xlane.f32.xlu1 %v2334_v9 }
 0x9d6   : > { %v2336_v10 = vpop.xlane.xlu1 %2335 }
 0x9d7   : > { %v2337_v11 = vmul.f32 0.015625, %v2336_v10 }
 0x9d9   : > { %v2338_v12 = vsub.f32 %v2331_v8, %v2337_v11 }
 0x9db   : > { %v2339_v5 = vmul.f32 %v2338_v12, %v2338_v12 }
 0x9dd   : > { %v2340_v13 = vsel %vm606_vm1, %v2339_v5, 0.0 }
 0x9de   : > { %2341 = vadd.xlane.f32.xlu0 %v2340_v13 }
 0xa6b   : > { %v2342_v14 = vpop.xlane.xlu0 %2341 }
 0xa6c   : > { %v2343_v15 = vmul.f32 0.015625, %v2342_v14 }
 0xa6e   : > { %v2344_v16 = vadd.f32 1e-05, %v2343_v15 }
 0xa70   : > { %2897 = vrsqrt.f32 %v2344_v16 }
 0xa7a   : > { %v2898_v17 = vpop.eup %2897 }
 0xa7b   : > { %v2346_v19 = vmul.f32 %v2898_v17, %v2338_v12 }
 0xa7d   : > { %v2353_v21 = vmul.f32 %v2546_v18, %v2346_v19 }
 0xa7f   : > { %v2360_v22 = vadd.f32 %v2547_v20, %v2353_v21 }
 0xa81   : > { %2361 = vst.msk [vmem:[%s563_s16] sm:$0xff] %vm606_vm1, %v2360_v22 }
 0xa82   : > { %2942 = shalt.err (!%p2939_p4)
}
 0xa83   : > { %s2943_s2 = scalar_lea.hbm %s3516_s5, 128  ;;  %s2947_s1 = scalar_lea.hbm %s3621_s4, 256 }
 0xa84   : > { %p2944_p5 = scmp.ne.s32.totalorder %s3516_s5, %s2943_s2  ;;  %p2948_p0 = scmp.lt.u32.totalorder %s3516_s5, %s3621_s4 }
 0xa85   : > { %p2949_p1 = scmp.lt.u32.totalorder %s2947_s1, %s2943_s2  ;;  %p2951_p6 = scmp.lt.u32.totalorder %s2943_s2, %s3516_s5 }
 0xa86   : > { %p2945_p8 = pnand %p2944_p5, %p3622_p11 }
 0xa87   : > { %p2950_p3 = por %p2949_p1, %p2948_p0 }
 0xa88   : > { %p2946_p9 = pneg %p2945_p8 }
 0xa89   : > { %p2952_p12 = por %p2951_p6, %p2950_p3 }
 0xa8b   : > { %p2953_p13 = pnand %p2952_p12, %p2946_p9 }
 0xa8d   : > { %2956 = shalt.err (!%p2953_p13)
}
 0xa8e   : > { %2772 = dma.vmem_to_hbm [thread:$0]  (%p3622_p11), %s3518_s0, 128, %s3516_s5, %s2363_s23  }
 0xa8f PF: > { %s3623_s15 = sld [smem:[#allocation8_spill]]  ;;  %p3624_p7 = scmp.ne.s32.totalorder %s3606_s22, 0 }
 0xa90   : > { %p3625_p10 = scmp.ge.s32.totalorder %s2995_s27, 2 }
 0xa92   : > { %p2779_p2 = pnand %p3625_p10, %p3624_p7 }
 0xa95   : > { %s2388_s16 = sand.u32 1, %s3623_s15  }
 0xa96   : > { %s2389_s20 = scalar_lea.sflag [#allocation4], %s2388_s16 }
 0xa97   : > { %2978 = dma.done.wait (!%p2779_p2), %s2389_s20, 128  }
 0xa98   : > { %2980 = vsyncadd (!%p2779_p2), %s2389_s20, 4294967168  ;;  %s3626_s27 = sld [smem:[#allocation9_spill]]  ;;  %s3627_s28 = sld [smem:[#allocation10_spill]] }
 0xa99   : > { %s3628_s24 = smov %s2987_s25  ;;  %s3629_s25 = smov %s2991_s26 }
 0xa9e   : > { %p30_p4 = scmp.ge.s32.totalorder %s3626_s27, 4   ;;  %s3630_s26 = smov %s3627_s28 }
 0xaa0   :  { %32 = sbr.rel (!%p30_p4) target bundleno = 15 (0xf), region = 133 }
 0xaa7   :  { %2394 = vsyncpa [#allocation3], 1 }
 0xaa8   :  { %2396 = vsyncpa [#allocation3 + $0x1], 1 }
 0xaa9   :  { %2397 = vsyncpa [#allocation4], 1 }
 0xaaa   :  { %2399 = vsyncpa [#allocation4 + $0x1], 1 }

</bundles_post_ra>
